<compile_context>
chip_gen: v6e
topology: v6e:2x2x1
jax: 0.10.0
libtpu: 0.0.40
codegen_flags: <defaults>
</compile_context>

<pallas_src>
import functools

import jax
import jax.numpy as jnp
import numpy as np
from jax.experimental import pallas as pl
from jax.experimental.pallas import tpu as pltpu

# ---- model dimensions (forward implies in = 7 + 7 + 12 + 15 = 41) ----------
POS, TRQ, TAC, IMG = 7, 7, 12, 15
IN_DIM = POS + TRQ + TAC + IMG          # 41
OUT_DIM = IN_DIM                        # last_output is blended back with x
IO, CF, CS = 32, 32, 16                 # synthetic MTRNN layer sizes
ATT_H = 100                             # attention MLP hidden width
TAU_IO, TAU_CF, TAU_CS = 2.0, 5.0, 70.0
OPEN_RATE = 1.0                         # blend with last_output is identity

LANES = 128                             # lane width for all padded slabs
NBIAS = 16                              # rows in the bias/mask slab
MAX_CHUNK = 8                           # max timesteps folded per grid step


def _gated_mtrnn_kernel(x_ref, init_ref, w_ref, b_ref, out_ref, fin_ref,
                        u_scr, y_scr, *, chunk, batch):
    """One chunk of `chunk` timesteps per grid iteration.

    x_ref   : (chunk*batch, 128)   lane-dense padded inputs for this chunk
    init_ref: (batch, 256)         initial state  u(io|cf|cs) | y(io|cf|cs)
    w_ref   : (6, 128, 128)        packed weights (VMEM-resident all sequence)
    b_ref   : (16, 128)            biases + decay/gain + gate lane masks
    out_ref : (chunk*batch, 256)   out | att   (lane-dense)
    fin_ref : (batch, 256)         final u | y  (written once per chunk)
    u_scr/y_scr: (batch, 128)      recurrent state carried across grid steps
    """
    f32 = jnp.float32

    # ---- load initial state into scratch on the first grid step ------------
    @pl.when(pl.program_id(0) == 0)
    def _():
        u_scr[...] = init_ref[:, :LANES]
        y_scr[...] = init_ref[:, LANES:]

    # ---- batched x-only pre-pass (M = chunk*batch rows on the MXU) ---------
    x = x_ref[...]                                           # (chunk*batch,128)
    h = jnp.maximum(
        jnp.dot(x, w_ref[0], preferred_element_type=f32) + b_ref[0:1, :], 0.0)
    h = jnp.maximum(
        jnp.dot(h, w_ref[1], preferred_element_type=f32) + b_ref[1:2, :], 0.0)
    att = jax.nn.sigmoid(
        jnp.dot(h, w_ref[2], preferred_element_type=f32) + b_ref[2:3, :])
    # store att lane block now (wrapper only reads lanes 0..2)
    out_ref[:, LANES:2 * LANES] = att

    # modality gate from host-precomputed lane masks (rows 7..10)
    gate = (b_ref[7:8, :]
            + att[:, 0:1] * b_ref[8:9, :]
            + att[:, 1:2] * b_ref[9:10, :]
            + att[:, 2:3] * b_ref[10:11, :])
    # input projection + all biases (b_io|b_cf|b_cs), batched over the chunk
    pre_in = jnp.dot(x * gate, w_ref[3], preferred_element_type=f32) + b_ref[3:4, :]

    decay = b_ref[5:6, :]                                    # 1 - 1/tau per lane
    gain = b_ref[6:7, :]                                     # 1/tau per lane

    # ---- sequential recurrence: ONE small fused matmul per step ------------
    u = u_scr[...]
    y = y_scr[...]
    ys = []
    for t in range(chunk):                                   # static unroll
        rec = jnp.dot(y, w_ref[4], preferred_element_type=f32)
        u = decay * u + gain * (pre_in[t * batch:(t + 1) * batch, :] + rec)
        y = jnp.tanh(u)
        ys.append(y)
    u_scr[...] = u
    y_scr[...] = y
    fin_ref[:, :LANES] = u                                   # final state (tiny)
    fin_ref[:, LANES:] = y

    # ---- batched output head post-pass --------------------------------------
    y_all = jnp.concatenate(ys, axis=0)                      # (chunk*batch, 128)
    out_ref[:, 0:LANES] = jnp.tanh(
        jnp.dot(y_all, w_ref[5], preferred_element_type=f32) + b_ref[4:5, :])


def _chunk_len(T, max_chunk=MAX_CHUNK):
    for tt in range(min(T, max_chunk), 0, -1):
        if T % tt == 0:
            return tt
    return 1


@jax.jit
def gated_mtrnn_forward_seq(x_seq, state, packed):
    """Run GatedMTRNN over a whole sequence.

    x_seq: [T, B, 41].  Returns (out [T,B,41], att [T,B,3], new_state tuple).
    """
    W, Bm = packed
    T, B, D = x_seq.shape
    assert D == IN_DIM
    TT = _chunk_len(T)
    n_chunks = T // TT

    # lane-dense flat input slab [T*B, 128]
    x_flat = jnp.zeros((T * B, LANES), jnp.float32).at[:, :IN_DIM].set(
        x_seq.reshape(T * B, IN_DIM))

    # pack initial state into one [B, 256] slab:  u(io|cf|cs) | y(io|cf|cs)
    io_u, io_y, cf_u, cf_y, cs_u, cs_y = state
    init = jnp.zeros((B, 2 * LANES), jnp.float32)
    init = (init.at[:, 0:IO].set(io_u)
                .at[:, IO:IO + CF].set(cf_u)
                .at[:, IO + CF:IO + CF + CS].set(cs_u)
                .at[:, LANES:LANES + IO].set(io_y)
                .at[:, LANES + IO:LANES + IO + CF].set(cf_y)
                .at[:, LANES + IO + CF:LANES + IO + CF + CS].set(cs_y))

    slab, fin = pl.pallas_call(
        functools.partial(_gated_mtrnn_kernel, chunk=TT, batch=B),
        out_shape=(jax.ShapeDtypeStruct((T * B, 2 * LANES), jnp.float32),
                   jax.ShapeDtypeStruct((B, 2 * LANES), jnp.float32)),
        grid=(n_chunks,),
        in_specs=[
            pl.BlockSpec((TT * B, LANES), lambda c: (c, 0)),          # x chunk
            pl.BlockSpec((B, 2 * LANES), lambda c: (0, 0)),           # init
            pl.BlockSpec((6, LANES, LANES), lambda c: (0, 0, 0)),     # weights
            pl.BlockSpec((NBIAS, LANES), lambda c: (0, 0)),           # biases
        ],
        out_specs=(pl.BlockSpec((TT * B, 2 * LANES), lambda c: (c, 0)),
                   pl.BlockSpec((B, 2 * LANES), lambda c: (0, 0))),
        scratch_shapes=[pltpu.VMEM((B, LANES), jnp.float32),          # u state
                        pltpu.VMEM((B, LANES), jnp.float32)],         # y state
        compiler_params=pltpu.CompilerParams(
            dimension_semantics=("arbitrary",)),                      # recurrent
    )(x_flat, init, W, Bm)

    slab = slab.reshape(T, B, 2 * LANES)
    out = slab[:, :, :OUT_DIM]
    att = slab[:, :, LANES:LANES + 3]
    u_last = fin[:, :LANES]
    y_last = fin[:, LANES:]
    new_state = (u_last[:, :IO], y_last[:, :IO],
                 u_last[:, IO:IO + CF], y_last[:, IO:IO + CF],
                 u_last[:, IO + CF:IO + CF + CS],
                 y_last[:, IO + CF:IO + CF + CS])
    return out, att, new_state


# ------------------------- parameter / state setup --------------------------
def init_params(key):
    ks = jax.random.split(key, 14)

    def w(k, shape, scale=0.1):
        return (scale * jax.random.normal(k, shape)).astype(jnp.float32)

    # attention MLP (weights stored as [in, out])
    a1_w, a1_b = w(ks[0], (IN_DIM, ATT_H)), w(ks[1], (1, ATT_H))
    a2_w, a2_b = w(ks[2], (ATT_H, ATT_H)), w(ks[3], (1, ATT_H))
    a3_w, a3_b = w(ks[4], (ATT_H, 3)), w(ks[5], (1, 3))

    # MTRNN weights ([in, out]) and biases
    w_i2io = w(ks[6], (IN_DIM, IO))
    w_io2io = w(ks[7], (IO, IO))
    w_cf2io = w(ks[8], (CF, IO))
    b_io = w(ks[9], (1, IO))
    w_io2cf = w(ks[10], (IO, CF))
    w_cf2cf = w(ks[11], (CF, CF))
    w_cs2cf = w(ks[12], (CS, CF))
    b_cf = w(ks[13], (1, CF))
    ks2 = jax.random.split(jax.random.fold_in(key, 7), 5)
    w_cf2cs = w(ks2[0], (CF, CS))
    w_cs2cs = w(ks2[1], (CS, CS))
    b_cs = w(ks2[2], (1, CS))
    w_io2o = w(ks2[3], (IO, OUT_DIM))
    b_o = w(ks2[4], (1, OUT_DIM))

    return (a1_w, a1_b, a2_w, a2_b, a3_w, a3_b,
            w_i2io, w_io2io, w_cf2io, b_io,
            w_io2cf, w_cf2cf, w_cs2cf, b_cf,
            w_cf2cs, w_cs2cs, b_cs,
            w_io2o, b_o)


def pack_params(params):
    """Pack weights into one [6,128,128] slab, biases+masks into [16,128]."""
    (a1_w, a1_b, a2_w, a2_b, a3_w, a3_b,
     w_i2io, w_io2io, w_cf2io, b_io,
     w_io2cf, w_cf2cf, w_cs2cf, b_cf,
     w_cf2cs, w_cs2cs, b_cs,
     w_io2o, b_o) = [np.asarray(p, np.float32) for p in params]

    W = np.zeros((6, LANES, LANES), np.float32)
    # attention MLP (zero-padded; padding rows/cols contribute exact zeros)
    W[0, :IN_DIM, :ATT_H] = a1_w
    W[1, :ATT_H, :ATT_H] = a2_w
    W[2, :ATT_H, :3] = a3_w
    # input -> io
    W[3, :IN_DIM, :IO] = w_i2io
    # fused recurrent block matrix on [io_y | cf_y | cs_y]
    W[4, :IO, :IO] = w_io2io
    W[4, IO:IO + CF, :IO] = w_cf2io
    W[4, :IO, IO:IO + CF] = w_io2cf
    W[4, IO:IO + CF, IO:IO + CF] = w_cf2cf
    W[4, IO + CF:IO + CF + CS, IO:IO + CF] = w_cs2cf
    W[4, IO:IO + CF, IO + CF:IO + CF + CS] = w_cf2cs
    W[4, IO + CF:IO + CF + CS, IO + CF:IO + CF + CS] = w_cs2cs
    # output head
    W[5, :IO, :OUT_DIM] = w_io2o

    Bm = np.zeros((NBIAS, LANES), np.float32)
    Bm[0, :ATT_H] = a1_b[0]
    Bm[1, :ATT_H] = a2_b[0]
    Bm[2, :3] = a3_b[0]
    Bm[3, :IO] = b_io[0]
    Bm[3, IO:IO + CF] = b_cf[0]
    Bm[3, IO + CF:IO + CF + CS] = b_cs[0]
    Bm[4, :OUT_DIM] = b_o[0]
    # leaky-integrator decay / gain lane vectors (host-precomputed)
    Bm[5, :IO] = 1.0 - 1.0 / TAU_IO
    Bm[5, IO:IO + CF] = 1.0 - 1.0 / TAU_CF
    Bm[5, IO + CF:IO + CF + CS] = 1.0 - 1.0 / TAU_CS
    Bm[6, :IO] = 1.0 / TAU_IO
    Bm[6, IO:IO + CF] = 1.0 / TAU_CF
    Bm[6, IO + CF:IO + CF + CS] = 1.0 / TAU_CS
    # modality-gate one-hot lane masks
    Bm[7, :POS] = 1.0
    Bm[8, POS:POS + TRQ] = 1.0
    Bm[9, POS + TRQ:POS + TRQ + TAC] = 1.0
    Bm[10, POS + TRQ + TAC:IN_DIM] = 1.0
    return jnp.asarray(W), jnp.asarray(Bm)


def init_state(batch_size):
    z = lambda n: jnp.zeros((batch_size, n), jnp.float32)
    return (z(IO), z(IO), z(CF), z(CF), z(CS), z(CS))


# ------------------------------ pure-JAX reference --------------------------
def _reference_seq(x_seq, state, params):
    (a1_w, a1_b, a2_w, a2_b, a3_w, a3_b,
     w_i2io, w_io2io, w_cf2io, b_io,
     w_io2cf, w_cf2cf, w_cs2cf, b_cf,
     w_cf2cs, w_cs2cs, b_cs,
     w_io2o, b_o) = params
    io_u, io_y, cf_u, cf_y, cs_u, cs_y = state

    outs, atts = [], []
    for t in range(x_seq.shape[0]):
        x = x_seq[t]
        h = jnp.maximum(x @ a1_w + a1_b, 0.0)
        h = jnp.maximum(h @ a2_w + a2_b, 0.0)
        att = jax.nn.sigmoid(h @ a3_w + a3_b)
        position = x[:, :POS]
        torque = x[:, POS:POS + TRQ] * att[:, 0:1]
        tactile = x[:, POS + TRQ:POS + TRQ + TAC] * att[:, 1:2]
        img = x[:, POS + TRQ + TAC:] * att[:, 2:3]
        temp = jnp.concatenate([position, torque, tactile, img], axis=1)

        io_in = temp @ w_i2io + io_y @ w_io2io + cf_y @ w_cf2io + b_io
        cf_in = io_y @ w_io2cf + cf_y @ w_cf2cf + cs_y @ w_cs2cf + b_cf
        cs_in = cf_y @ w_cf2cs + cs_y @ w_cs2cs + b_cs
        io_u = (1 - 1 / TAU_IO) * io_u + (1 / TAU_IO) * io_in
        cf_u = (1 - 1 / TAU_CF) * cf_u + (1 / TAU_CF) * cf_in
        cs_u = (1 - 1 / TAU_CS) * cs_u + (1 / TAU_CS) * cs_in
        io_y = jnp.tanh(io_u)
        cf_y = jnp.tanh(cf_u)
        cs_y = jnp.tanh(cs_u)
        out = jnp.tanh(io_y @ w_io2o + b_o)
        outs.append(out)
        atts.append(att)
    return (jnp.stack(outs), jnp.stack(atts),
            (io_u, io_y, cf_u, cf_y, cs_u, cs_y))


if __name__ == "__main__":
    key = jax.random.PRNGKey(0)
    pkey, xkey = jax.random.split(key)

    B, T = 8, 16                      # T=16 -> two chunks of 8 steps each
    params = init_params(pkey)
    packed = pack_params(params)
    state = init_state(B)
    x_seq = jax.random.normal(xkey, (T, B, IN_DIM), dtype=jnp.float32)

    out, att, new_state = gated_mtrnn_forward_seq(x_seq, state, packed)
    jax.block_until_ready(out)

    ref_out, ref_att, ref_state = _reference_seq(x_seq, state, params)
    np.testing.assert_allclose(np.asarray(out), np.asarray(ref_out),
                               rtol=1e-4, atol=1e-4)
    np.testing.assert_allclose(np.asarray(att), np.asarray(ref_att),
                               rtol=1e-4, atol=1e-4)
    for got, want in zip(new_state, ref_state):
        np.testing.assert_allclose(np.asarray(got), np.asarray(want),
                                   rtol=1e-4, atol=1e-4)
    print("KERNEL_OK")
</pallas_src>

<mosaic_0001>
module attributes {stable_mosaic.version = 11 : i64} {
  func.func @_gated_mtrnn_kernel(%arg0: i32, %arg1: memref<64x128xf32, #tpu.memory_space<vmem>>, %arg2: memref<8x256xf32, #tpu.memory_space<vmem>>, %arg3: memref<6x128x128xf32, #tpu.memory_space<vmem>>, %arg4: memref<16x128xf32, #tpu.memory_space<vmem>>, %arg5: memref<64x256xf32, #tpu.memory_space<vmem>>, %arg6: memref<8x256xf32, #tpu.memory_space<vmem>>, %arg7: memref<8x128xf32, #tpu.memory_space<vmem>>, %arg8: memref<8x128xf32, #tpu.memory_space<vmem>>) attributes {dimension_semantics = [#tpu.dimension_semantics<arbitrary>], iteration_bounds = array<i64: 2>, scalar_prefetch = 0 : i64, scratch_operands = 2 : i64, tpu.core_type = #tpu.core_type<tc>, window_params = [{transform_indices = @transform_0, window_bounds = array<i64: 64, 128>}, {pipeline_mode = #tpu.pipeline_mode<synchronous>, transform_indices = @transform_1, window_bounds = array<i64: 8, 256>}, {pipeline_mode = #tpu.pipeline_mode<synchronous>, transform_indices = @transform_2, window_bounds = array<i64: 6, 128, 128>}, {pipeline_mode = #tpu.pipeline_mode<synchronous>, transform_indices = @transform_3, window_bounds = array<i64: 16, 128>}, {transform_indices = @transform_4, window_bounds = array<i64: 64, 256>}, {pipeline_mode = #tpu.pipeline_mode<synchronous>, transform_indices = @transform_5, window_bounds = array<i64: 8, 256>}]} {
    %c0_i32 = arith.constant 0 : i32
    %0 = arith.cmpi eq, %arg0, %c0_i32 : i32
    %1 = arith.extui %0 : i1 to i32
    %c0_i32_0 = arith.constant 0 : i32
    %2 = arith.cmpi ne, %1, %c0_i32_0 : i32
    scf.if %2 {
      %c0_83 = arith.constant 0 : index
      %c0_84 = arith.constant 0 : index
      %164 = vector.load %arg2[%c0_83, %c0_84] : memref<8x256xf32, #tpu.memory_space<vmem>>, vector<8x128xf32>
      %c0_85 = arith.constant 0 : index
      %c0_86 = arith.constant 0 : index
      %165 = vector.load %arg7[%c0_85, %c0_86] : memref<8x128xf32, #tpu.memory_space<vmem>>, vector<8x128xf32>
      tpu.vector_store %arg7[%c0_85, %c0_86], %164 {strides = array<i32>} : memref<8x128xf32, #tpu.memory_space<vmem>>, vector<8x128xf32>,
      %c0_87 = arith.constant 0 : index
      %c128_88 = arith.constant 128 : index
      %166 = vector.load %arg2[%c0_87, %c128_88] : memref<8x256xf32, #tpu.memory_space<vmem>>, vector<8x128xf32>
      %c0_89 = arith.constant 0 : index
      %c0_90 = arith.constant 0 : index
      %167 = vector.load %arg8[%c0_89, %c0_90] : memref<8x128xf32, #tpu.memory_space<vmem>>, vector<8x128xf32>
      tpu.vector_store %arg8[%c0_89, %c0_90], %166 {strides = array<i32>} : memref<8x128xf32, #tpu.memory_space<vmem>>, vector<8x128xf32>,
    } else {
    }
    %c0 = arith.constant 0 : index
    %c0_1 = arith.constant 0 : index
    %3 = vector.load %arg1[%c0, %c0_1] : memref<64x128xf32, #tpu.memory_space<vmem>>, vector<64x128xf32>
    %c0_2 = arith.constant 0 : index
    %c0_3 = arith.constant 0 : index
    %c0_4 = arith.constant 0 : index
    %4 = vector.load %arg3[%c0_2, %c0_3, %c0_4] : memref<6x128x128xf32, #tpu.memory_space<vmem>>, vector<1x128x128xf32>
    %5 = vector.shape_cast %4 : vector<1x128x128xf32> to vector<128x128xf32>
    %cst = arith.constant dense<0.000000e+00> : vector<64x128xf32>
    %6 = tpu.matmul %3, %5, %cst {dimension_numbers = #tpu.dot_dimension_numbers<[1], [0], [0], [1], [0, 0, 1, 1], [], []>} : vector<64x128xf32>, vector<128x128xf32>, vector<64x128xf32> -> vector<64x128xf32>
    %c0_5 = arith.constant 0 : index
    %c0_6 = arith.constant 0 : index
    %7 = vector.load %arg4[%c0_5, %c0_6] : memref<16x128xf32, #tpu.memory_space<vmem>>, vector<1x128xf32>
    %8 = vector.broadcast %7 : vector<1x128xf32> to vector<64x128xf32>
    %9 = arith.addf %6, %8 : vector<64x128xf32>
    %cst_7 = arith.constant 0.000000e+00 : f32
    %10 = vector.broadcast %cst_7 : f32 to vector<64x128xf32>
    %11 = arith.maximumf %9, %10 : vector<64x128xf32>
    %c1 = arith.constant 1 : index
    %c0_8 = arith.constant 0 : index
    %c0_9 = arith.constant 0 : index
    %12 = vector.load %arg3[%c1, %c0_8, %c0_9] : memref<6x128x128xf32, #tpu.memory_space<vmem>>, vector<1x128x128xf32>
    %13 = vector.shape_cast %12 : vector<1x128x128xf32> to vector<128x128xf32>
    %cst_10 = arith.constant dense<0.000000e+00> : vector<64x128xf32>
    %14 = tpu.matmul %11, %13, %cst_10 {dimension_numbers = #tpu.dot_dimension_numbers<[1], [0], [0], [1], [0, 0, 1, 1], [], []>} : vector<64x128xf32>, vector<128x128xf32>, vector<64x128xf32> -> vector<64x128xf32>
    %c1_11 = arith.constant 1 : index
    %c0_12 = arith.constant 0 : index
    %15 = vector.load %arg4[%c1_11, %c0_12] : memref<16x128xf32, #tpu.memory_space<vmem>>, vector<1x128xf32>
    %16 = vector.broadcast %15 : vector<1x128xf32> to vector<64x128xf32>
    %17 = arith.addf %14, %16 : vector<64x128xf32>
    %cst_13 = arith.constant 0.000000e+00 : f32
    %18 = vector.broadcast %cst_13 : f32 to vector<64x128xf32>
    %19 = arith.maximumf %17, %18 : vector<64x128xf32>
    %c2 = arith.constant 2 : index
    %c0_14 = arith.constant 0 : index
    %c0_15 = arith.constant 0 : index
    %20 = vector.load %arg3[%c2, %c0_14, %c0_15] : memref<6x128x128xf32, #tpu.memory_space<vmem>>, vector<1x128x128xf32>
    %21 = vector.shape_cast %20 : vector<1x128x128xf32> to vector<128x128xf32>
    %cst_16 = arith.constant dense<0.000000e+00> : vector<64x128xf32>
    %22 = tpu.matmul %19, %21, %cst_16 {dimension_numbers = #tpu.dot_dimension_numbers<[1], [0], [0], [1], [0, 0, 1, 1], [], []>} : vector<64x128xf32>, vector<128x128xf32>, vector<64x128xf32> -> vector<64x128xf32>
    %c2_17 = arith.constant 2 : index
    %c0_18 = arith.constant 0 : index
    %23 = vector.load %arg4[%c2_17, %c0_18] : memref<16x128xf32, #tpu.memory_space<vmem>>, vector<1x128xf32>
    %24 = vector.broadcast %23 : vector<1x128xf32> to vector<64x128xf32>
    %25 = arith.addf %22, %24 : vector<64x128xf32>
    %26 = arith.negf %25 : vector<64x128xf32>
    %27 = math.exp %26 : vector<64x128xf32>
    %cst_19 = arith.constant 1.000000e+00 : f32
    %28 = vector.broadcast %cst_19 : f32 to vector<64x128xf32>
    %29 = arith.addf %28, %27 : vector<64x128xf32>
    %30 = arith.divf %28, %29 : vector<64x128xf32>
    %c0_20 = arith.constant 0 : index
    %c128 = arith.constant 128 : index
    %31 = vector.load %arg5[%c0_20, %c128] : memref<64x256xf32, #tpu.memory_space<vmem>>, vector<64x128xf32>
    tpu.vector_store %arg5[%c0_20, %c128], %30 {strides = array<i32>} : memref<64x256xf32, #tpu.memory_space<vmem>>, vector<64x128xf32>,
    %c7 = arith.constant 7 : index
    %c0_21 = arith.constant 0 : index
    %32 = vector.load %arg4[%c7, %c0_21] : memref<16x128xf32, #tpu.memory_space<vmem>>, vector<1x128xf32>
    %33 = vector.extract_strided_slice %30 {offsets = [0, 0], sizes = [64, 1], strides = [1, 1]} : vector<64x128xf32> to vector<64x1xf32>
    %c8 = arith.constant 8 : index
    %c0_22 = arith.constant 0 : index
    %34 = vector.load %arg4[%c8, %c0_22] : memref<16x128xf32, #tpu.memory_space<vmem>>, vector<1x128xf32>
    %35 = vector.broadcast %33 : vector<64x1xf32> to vector<64x128xf32>
    %36 = vector.broadcast %34 : vector<1x128xf32> to vector<64x128xf32>
    %37 = arith.mulf %35, %36 : vector<64x128xf32>
    %38 = vector.broadcast %32 : vector<1x128xf32> to vector<64x128xf32>
    %39 = arith.addf %38, %37 : vector<64x128xf32>
    %40 = vector.extract_strided_slice %30 {offsets = [0, 1], sizes = [64, 1], strides = [1, 1]} : vector<64x128xf32> to vector<64x1xf32>
    %c9 = arith.constant 9 : index
    %c0_23 = arith.constant 0 : index
    %41 = vector.load %arg4[%c9, %c0_23] : memref<16x128xf32, #tpu.memory_space<vmem>>, vector<1x128xf32>
    %42 = vector.broadcast %40 : vector<64x1xf32> to vector<64x128xf32>
    %43 = vector.broadcast %41 : vector<1x128xf32> to vector<64x128xf32>
    %44 = arith.mulf %42, %43 : vector<64x128xf32>
    %45 = arith.addf %39, %44 : vector<64x128xf32>
    %46 = vector.extract_strided_slice %30 {offsets = [0, 2], sizes = [64, 1], strides = [1, 1]} : vector<64x128xf32> to vector<64x1xf32>
    %c10 = arith.constant 10 : index
    %c0_24 = arith.constant 0 : index
    %47 = vector.load %arg4[%c10, %c0_24] : memref<16x128xf32, #tpu.memory_space<vmem>>, vector<1x128xf32>
    %48 = vector.broadcast %46 : vector<64x1xf32> to vector<64x128xf32>
    %49 = vector.broadcast %47 : vector<1x128xf32> to vector<64x128xf32>
    %50 = arith.mulf %48, %49 : vector<64x128xf32>
    %51 = arith.addf %45, %50 : vector<64x128xf32>
    %52 = arith.mulf %3, %51 : vector<64x128xf32>
    %c3 = arith.constant 3 : index
    %c0_25 = arith.constant 0 : index
    %c0_26 = arith.constant 0 : index
    %53 = vector.load %arg3[%c3, %c0_25, %c0_26] : memref<6x128x128xf32, #tpu.memory_space<vmem>>, vector<1x128x128xf32>
    %54 = vector.shape_cast %53 : vector<1x128x128xf32> to vector<128x128xf32>
    %cst_27 = arith.constant dense<0.000000e+00> : vector<64x128xf32>
    %55 = tpu.matmul %52, %54, %cst_27 {dimension_numbers = #tpu.dot_dimension_numbers<[1], [0], [0], [1], [0, 0, 1, 1], [], []>} : vector<64x128xf32>, vector<128x128xf32>, vector<64x128xf32> -> vector<64x128xf32>
    %c3_28 = arith.constant 3 : index
    %c0_29 = arith.constant 0 : index
    %56 = vector.load %arg4[%c3_28, %c0_29] : memref<16x128xf32, #tpu.memory_space<vmem>>, vector<1x128xf32>
    %57 = vector.broadcast %56 : vector<1x128xf32> to vector<64x128xf32>
    %58 = arith.addf %55, %57 : vector<64x128xf32>
    %c5 = arith.constant 5 : index
    %c0_30 = arith.constant 0 : index
    %59 = vector.load %arg4[%c5, %c0_30] : memref<16x128xf32, #tpu.memory_space<vmem>>, vector<1x128xf32>
    %c6 = arith.constant 6 : index
    %c0_31 = arith.constant 0 : index
    %60 = vector.load %arg4[%c6, %c0_31] : memref<16x128xf32, #tpu.memory_space<vmem>>, vector<1x128xf32>
    %c0_32 = arith.constant 0 : index
    %c0_33 = arith.constant 0 : index
    %61 = vector.load %arg7[%c0_32, %c0_33] : memref<8x128xf32, #tpu.memory_space<vmem>>, vector<8x128xf32>
    %c0_34 = arith.constant 0 : index
    %c0_35 = arith.constant 0 : index
    %62 = vector.load %arg8[%c0_34, %c0_35] : memref<8x128xf32, #tpu.memory_space<vmem>>, vector<8x128xf32>
    %c4 = arith.constant 4 : index
    %c0_36 = arith.constant 0 : index
    %c0_37 = arith.constant 0 : index
    %63 = vector.load %arg3[%c4, %c0_36, %c0_37] : memref<6x128x128xf32, #tpu.memory_space<vmem>>, vector<1x128x128xf32>
    %64 = vector.shape_cast %63 : vector<1x128x128xf32> to vector<128x128xf32>
    %cst_38 = arith.constant dense<0.000000e+00> : vector<8x128xf32>
    %65 = tpu.matmul %62, %64, %cst_38 {dimension_numbers = #tpu.dot_dimension_numbers<[1], [0], [0], [1], [0, 0, 1, 1], [], []>} : vector<8x128xf32>, vector<128x128xf32>, vector<8x128xf32> -> vector<8x128xf32>
    %66 = vector.broadcast %59 : vector<1x128xf32> to vector<8x128xf32>
    %67 = arith.mulf %66, %61 : vector<8x128xf32>
    %68 = vector.extract_strided_slice %58 {offsets = [0, 0], sizes = [8, 128], strides = [1, 1]} : vector<64x128xf32> to vector<8x128xf32>
    %69 = arith.addf %68, %65 : vector<8x128xf32>
    %70 = vector.broadcast %60 : vector<1x128xf32> to vector<8x128xf32>
    %71 = arith.mulf %70, %69 : vector<8x128xf32>
    %72 = arith.addf %67, %71 : vector<8x128xf32>
    %73 = math.tanh %72 : vector<8x128xf32>
    %c4_39 = arith.constant 4 : index
    %c0_40 = arith.constant 0 : index
    %c0_41 = arith.constant 0 : index
    %74 = vector.load %arg3[%c4_39, %c0_40, %c0_41] : memref<6x128x128xf32, #tpu.memory_space<vmem>>, vector<1x128x128xf32>
    %75 = vector.shape_cast %74 : vector<1x128x128xf32> to vector<128x128xf32>
    %cst_42 = arith.constant dense<0.000000e+00> : vector<8x128xf32>
    %76 = tpu.matmul %73, %75, %cst_42 {dimension_numbers = #tpu.dot_dimension_numbers<[1], [0], [0], [1], [0, 0, 1, 1], [], []>} : vector<8x128xf32>, vector<128x128xf32>, vector<8x128xf32> -> vector<8x128xf32>
    %77 = vector.broadcast %59 : vector<1x128xf32> to vector<8x128xf32>
    %78 = arith.mulf %77, %72 : vector<8x128xf32>
    %79 = vector.extract_strided_slice %58 {offsets = [8, 0], sizes = [8, 128], strides = [1, 1]} : vector<64x128xf32> to vector<8x128xf32>
    %80 = arith.addf %79, %76 : vector<8x128xf32>
    %81 = vector.broadcast %60 : vector<1x128xf32> to vector<8x128xf32>
    %82 = arith.mulf %81, %80 : vector<8x128xf32>
    %83 = arith.addf %78, %82 : vector<8x128xf32>
    %84 = math.tanh %83 : vector<8x128xf32>
    %c4_43 = arith.constant 4 : index
    %c0_44 = arith.constant 0 : index
    %c0_45 = arith.constant 0 : index
    %85 = vector.load %arg3[%c4_43, %c0_44, %c0_45] : memref<6x128x128xf32, #tpu.memory_space<vmem>>, vector<1x128x128xf32>
    %86 = vector.shape_cast %85 : vector<1x128x128xf32> to vector<128x128xf32>
    %cst_46 = arith.constant dense<0.000000e+00> : vector<8x128xf32>
    %87 = tpu.matmul %84, %86, %cst_46 {dimension_numbers = #tpu.dot_dimension_numbers<[1], [0], [0], [1], [0, 0, 1, 1], [], []>} : vector<8x128xf32>, vector<128x128xf32>, vector<8x128xf32> -> vector<8x128xf32>
    %88 = vector.broadcast %59 : vector<1x128xf32> to vector<8x128xf32>
    %89 = arith.mulf %88, %83 : vector<8x128xf32>
    %90 = vector.extract_strided_slice %58 {offsets = [16, 0], sizes = [8, 128], strides = [1, 1]} : vector<64x128xf32> to vector<8x128xf32>
    %91 = arith.addf %90, %87 : vector<8x128xf32>
    %92 = vector.broadcast %60 : vector<1x128xf32> to vector<8x128xf32>
    %93 = arith.mulf %92, %91 : vector<8x128xf32>
    %94 = arith.addf %89, %93 : vector<8x128xf32>
    %95 = math.tanh %94 : vector<8x128xf32>
    %c4_47 = arith.constant 4 : index
    %c0_48 = arith.constant 0 : index
    %c0_49 = arith.constant 0 : index
    %96 = vector.load %arg3[%c4_47, %c0_48, %c0_49] : memref<6x128x128xf32, #tpu.memory_space<vmem>>, vector<1x128x128xf32>
    %97 = vector.shape_cast %96 : vector<1x128x128xf32> to vector<128x128xf32>
    %cst_50 = arith.constant dense<0.000000e+00> : vector<8x128xf32>
    %98 = tpu.matmul %95, %97, %cst_50 {dimension_numbers = #tpu.dot_dimension_numbers<[1], [0], [0], [1], [0, 0, 1, 1], [], []>} : vector<8x128xf32>, vector<128x128xf32>, vector<8x128xf32> -> vector<8x128xf32>
    %99 = vector.broadcast %59 : vector<1x128xf32> to vector<8x128xf32>
    %100 = arith.mulf %99, %94 : vector<8x128xf32>
    %101 = vector.extract_strided_slice %58 {offsets = [24, 0], sizes = [8, 128], strides = [1, 1]} : vector<64x128xf32> to vector<8x128xf32>
    %102 = arith.addf %101, %98 : vector<8x128xf32>
    %103 = vector.broadcast %60 : vector<1x128xf32> to vector<8x128xf32>
    %104 = arith.mulf %103, %102 : vector<8x128xf32>
    %105 = arith.addf %100, %104 : vector<8x128xf32>
    %106 = math.tanh %105 : vector<8x128xf32>
    %c4_51 = arith.constant 4 : index
    %c0_52 = arith.constant 0 : index
    %c0_53 = arith.constant 0 : index
    %107 = vector.load %arg3[%c4_51, %c0_52, %c0_53] : memref<6x128x128xf32, #tpu.memory_space<vmem>>, vector<1x128x128xf32>
    %108 = vector.shape_cast %107 : vector<1x128x128xf32> to vector<128x128xf32>
    %cst_54 = arith.constant dense<0.000000e+00> : vector<8x128xf32>
    %109 = tpu.matmul %106, %108, %cst_54 {dimension_numbers = #tpu.dot_dimension_numbers<[1], [0], [0], [1], [0, 0, 1, 1], [], []>} : vector<8x128xf32>, vector<128x128xf32>, vector<8x128xf32> -> vector<8x128xf32>
    %110 = vector.broadcast %59 : vector<1x128xf32> to vector<8x128xf32>
    %111 = arith.mulf %110, %105 : vector<8x128xf32>
    %112 = vector.extract_strided_slice %58 {offsets = [32, 0], sizes = [8, 128], strides = [1, 1]} : vector<64x128xf32> to vector<8x128xf32>
    %113 = arith.addf %112, %109 : vector<8x128xf32>
    %114 = vector.broadcast %60 : vector<1x128xf32> to vector<8x128xf32>
    %115 = arith.mulf %114, %113 : vector<8x128xf32>
    %116 = arith.addf %111, %115 : vector<8x128xf32>
    %117 = math.tanh %116 : vector<8x128xf32>
    %c4_55 = arith.constant 4 : index
    %c0_56 = arith.constant 0 : index
    %c0_57 = arith.constant 0 : index
    %118 = vector.load %arg3[%c4_55, %c0_56, %c0_57] : memref<6x128x128xf32, #tpu.memory_space<vmem>>, vector<1x128x128xf32>
    %119 = vector.shape_cast %118 : vector<1x128x128xf32> to vector<128x128xf32>
    %cst_58 = arith.constant dense<0.000000e+00> : vector<8x128xf32>
    %120 = tpu.matmul %117, %119, %cst_58 {dimension_numbers = #tpu.dot_dimension_numbers<[1], [0], [0], [1], [0, 0, 1, 1], [], []>} : vector<8x128xf32>, vector<128x128xf32>, vector<8x128xf32> -> vector<8x128xf32>
    %121 = vector.broadcast %59 : vector<1x128xf32> to vector<8x128xf32>
    %122 = arith.mulf %121, %116 : vector<8x128xf32>
    %123 = vector.extract_strided_slice %58 {offsets = [40, 0], sizes = [8, 128], strides = [1, 1]} : vector<64x128xf32> to vector<8x128xf32>
    %124 = arith.addf %123, %120 : vector<8x128xf32>
    %125 = vector.broadcast %60 : vector<1x128xf32> to vector<8x128xf32>
    %126 = arith.mulf %125, %124 : vector<8x128xf32>
    %127 = arith.addf %122, %126 : vector<8x128xf32>
    %128 = math.tanh %127 : vector<8x128xf32>
    %c4_59 = arith.constant 4 : index
    %c0_60 = arith.constant 0 : index
    %c0_61 = arith.constant 0 : index
    %129 = vector.load %arg3[%c4_59, %c0_60, %c0_61] : memref<6x128x128xf32, #tpu.memory_space<vmem>>, vector<1x128x128xf32>
    %130 = vector.shape_cast %129 : vector<1x128x128xf32> to vector<128x128xf32>
    %cst_62 = arith.constant dense<0.000000e+00> : vector<8x128xf32>
    %131 = tpu.matmul %128, %130, %cst_62 {dimension_numbers = #tpu.dot_dimension_numbers<[1], [0], [0], [1], [0, 0, 1, 1], [], []>} : vector<8x128xf32>, vector<128x128xf32>, vector<8x128xf32> -> vector<8x128xf32>
    %132 = vector.broadcast %59 : vector<1x128xf32> to vector<8x128xf32>
    %133 = arith.mulf %132, %127 : vector<8x128xf32>
    %134 = vector.extract_strided_slice %58 {offsets = [48, 0], sizes = [8, 128], strides = [1, 1]} : vector<64x128xf32> to vector<8x128xf32>
    %135 = arith.addf %134, %131 : vector<8x128xf32>
    %136 = vector.broadcast %60 : vector<1x128xf32> to vector<8x128xf32>
    %137 = arith.mulf %136, %135 : vector<8x128xf32>
    %138 = arith.addf %133, %137 : vector<8x128xf32>
    %139 = math.tanh %138 : vector<8x128xf32>
    %c4_63 = arith.constant 4 : index
    %c0_64 = arith.constant 0 : index
    %c0_65 = arith.constant 0 : index
    %140 = vector.load %arg3[%c4_63, %c0_64, %c0_65] : memref<6x128x128xf32, #tpu.memory_space<vmem>>, vector<1x128x128xf32>
    %141 = vector.shape_cast %140 : vector<1x128x128xf32> to vector<128x128xf32>
    %cst_66 = arith.constant dense<0.000000e+00> : vector<8x128xf32>
    %142 = tpu.matmul %139, %141, %cst_66 {dimension_numbers = #tpu.dot_dimension_numbers<[1], [0], [0], [1], [0, 0, 1, 1], [], []>} : vector<8x128xf32>, vector<128x128xf32>, vector<8x128xf32> -> vector<8x128xf32>
    %143 = vector.broadcast %59 : vector<1x128xf32> to vector<8x128xf32>
    %144 = arith.mulf %143, %138 : vector<8x128xf32>
    %145 = vector.extract_strided_slice %58 {offsets = [56, 0], sizes = [8, 128], strides = [1, 1]} : vector<64x128xf32> to vector<8x128xf32>
    %146 = arith.addf %145, %142 : vector<8x128xf32>
    %147 = vector.broadcast %60 : vector<1x128xf32> to vector<8x128xf32>
    %148 = arith.mulf %147, %146 : vector<8x128xf32>
    %149 = arith.addf %144, %148 : vector<8x128xf32>
    %150 = math.tanh %149 : vector<8x128xf32>
    %c0_67 = arith.constant 0 : index
    %c0_68 = arith.constant 0 : index
    %151 = vector.load %arg7[%c0_67, %c0_68] : memref<8x128xf32, #tpu.memory_space<vmem>>, vector<8x128xf32>
    tpu.vector_store %arg7[%c0_67, %c0_68], %149 {strides = array<i32>} : memref<8x128xf32, #tpu.memory_space<vmem>>, vector<8x128xf32>,
    %c0_69 = arith.constant 0 : index
    %c0_70 = arith.constant 0 : index
    %152 = vector.load %arg8[%c0_69, %c0_70] : memref<8x128xf32, #tpu.memory_space<vmem>>, vector<8x128xf32>
    tpu.vector_store %arg8[%c0_69, %c0_70], %150 {strides = array<i32>} : memref<8x128xf32, #tpu.memory_space<vmem>>, vector<8x128xf32>,
    %c0_71 = arith.constant 0 : index
    %c0_72 = arith.constant 0 : index
    %153 = vector.load %arg6[%c0_71, %c0_72] : memref<8x256xf32, #tpu.memory_space<vmem>>, vector<8x128xf32>
    tpu.vector_store %arg6[%c0_71, %c0_72], %149 {strides = array<i32>} : memref<8x256xf32, #tpu.memory_space<vmem>>, vector<8x128xf32>,
    %c0_73 = arith.constant 0 : index
    %c128_74 = arith.constant 128 : index
    %154 = vector.load %arg6[%c0_73, %c128_74] : memref<8x256xf32, #tpu.memory_space<vmem>>, vector<8x128xf32>
    tpu.vector_store %arg6[%c0_73, %c128_74], %150 {strides = array<i32>} : memref<8x256xf32, #tpu.memory_space<vmem>>, vector<8x128xf32>,
    %155 = tpu.concatenate %73, %84, %95, %106, %117, %128, %139, %150 in 0 : vector<8x128xf32>, vector<8x128xf32>, vector<8x128xf32>, vector<8x128xf32>, vector<8x128xf32>, vector<8x128xf32>, vector<8x128xf32>, vector<8x128xf32> -> vector<64x128xf32>
    %c5_75 = arith.constant 5 : index
    %c0_76 = arith.constant 0 : index
    %c0_77 = arith.constant 0 : index
    %156 = vector.load %arg3[%c5_75, %c0_76, %c0_77] : memref<6x128x128xf32, #tpu.memory_space<vmem>>, vector<1x128x128xf32>
    %157 = vector.shape_cast %156 : vector<1x128x128xf32> to vector<128x128xf32>
    %cst_78 = arith.constant dense<0.000000e+00> : vector<64x128xf32>
    %158 = tpu.matmul %155, %157, %cst_78 {dimension_numbers = #tpu.dot_dimension_numbers<[1], [0], [0], [1], [0, 0, 1, 1], [], []>} : vector<64x128xf32>, vector<128x128xf32>, vector<64x128xf32> -> vector<64x128xf32>
    %c4_79 = arith.constant 4 : index
    %c0_80 = arith.constant 0 : index
    %159 = vector.load %arg4[%c4_79, %c0_80] : memref<16x128xf32, #tpu.memory_space<vmem>>, vector<1x128xf32>
    %160 = vector.broadcast %159 : vector<1x128xf32> to vector<64x128xf32>
    %161 = arith.addf %158, %160 : vector<64x128xf32>
    %162 = math.tanh %161 : vector<64x128xf32>
    %c0_81 = arith.constant 0 : index
    %c0_82 = arith.constant 0 : index
    %163 = vector.load %arg5[%c0_81, %c0_82] : memref<64x256xf32, #tpu.memory_space<vmem>>, vector<64x128xf32>
    tpu.vector_store %arg5[%c0_81, %c0_82], %162 {strides = array<i32>} : memref<64x256xf32, #tpu.memory_space<vmem>>, vector<64x128xf32>,
    return
  }
  func.func @transform_0(%arg0: i32) -> (i32, i32) {
    %c0_i32 = arith.constant 0 : i32
    %c0_i32_0 = arith.constant 0 : i32
    return %arg0, %c0_i32 : i32, i32
  }
  func.func @transform_1(%arg0: i32) -> (i32, i32) {
    %c0_i32 = arith.constant 0 : i32
    %c0_i32_0 = arith.constant 0 : i32
    %c0_i32_1 = arith.constant 0 : i32
    return %c0_i32, %c0_i32_0 : i32, i32
  }
  func.func @transform_2(%arg0: i32) -> (i32, i32, i32) {
    %c0_i32 = arith.constant 0 : i32
    %c0_i32_0 = arith.constant 0 : i32
    %c0_i32_1 = arith.constant 0 : i32
    %c0_i32_2 = arith.constant 0 : i32
    return %c0_i32, %c0_i32_0, %c0_i32_1 : i32, i32, i32
  }
  func.func @transform_3(%arg0: i32) -> (i32, i32) {
    %c0_i32 = arith.constant 0 : i32
    %c0_i32_0 = arith.constant 0 : i32
    %c0_i32_1 = arith.constant 0 : i32
    return %c0_i32, %c0_i32_0 : i32, i32
  }
  func.func @transform_4(%arg0: i32) -> (i32, i32) {
    %c0_i32 = arith.constant 0 : i32
    %c0_i32_0 = arith.constant 0 : i32
    return %arg0, %c0_i32 : i32, i32
  }
  func.func @transform_5(%arg0: i32) -> (i32, i32) {
    %c0_i32 = arith.constant 0 : i32
    %c0_i32_0 = arith.constant 0 : i32
    %c0_i32_1 = arith.constant 0 : i32
    return %c0_i32, %c0_i32_0 : i32, i32
  }
}

</mosaic_0001>

<bundles_post_ra>
// kernel: gated_mtrnn_forward_seq.1
= control target key start
LH: loop header
LB: loop body
LE: loop exit
PB: predicated region body
PF: predicated region fallthrough
CT: control target
= control target key end

     0   :  { %11 = vsyncpa [#allocation5], 0  ;;  %s2938_s18 = smov 0   ;;  %s3789_s0 = inlined_call_operand.vmem [shape: f32[128,128], index: 0, kind: input, shape index: {}]   ;;  %s3790_s1 = inlined_call_operand.vmem [shape: f32[8,256], index: 1, kind: input, shape index: {}]   ;;  %s3791_s2 = inlined_call_operand.vmem [shape: f32[6,128,128], index: 2, kind: input, shape index: {}]   ;;  %s3792_s3 = inlined_call_operand.hbm [shape: f32[16,128], index: 3, kind: input, shape index: {}]   ;;  %s3793_s4 = inlined_call_operand.vmem [shape: f32[128,256], index: 4, kind: output, shape index: {0}]   ;;  %s3794_s5 = inlined_call_operand.vmem [shape: f32[8,256], index: 5, kind: output, shape index: {1}]  }
   0x1 LB: > { %s2944_s19 = sadd.s32 4294967295, %s2898_s18   ;;  %p1872_p0 = scmp.ge.s32.totalorder %s2898_s18, 1  ;;  %s2898_s18 = sphi %s2938_s18, %s17_s18  }
   0x2   : > { %p158_p1 = scmp.lt.s32.totalorder %s2898_s18, 3  ;;  %s2900_s20 = smov [#allocation4]  }
   0x3   : > { %s176_s21 = sshll.u32 %s2900_s20, 4  ;;  %p2749_p4 = scmp.eq.s32.totalorder %s2944_s19, 0  ;;  %s177_s21 = int_to_ptr.vmem [resolvable:$true] %s176_s21 }
   0x4   : > { %p2949_p3 = pnand %p1872_p0, %p158_p1  ;;  %s2873_s23 = scalar_lea.vmem %s177_s21, 256 }
   0x5   : > { %p2874_p8 = scmp.ne.s32.totalorder %s177_s21, %s2873_s23  ;;  %p2881_p11 = scmp.lt.s32.totalorder %s177_s21, %s177_s21 }
   0x6   : > { %p2745_p5 = pneg %p2949_p3  ;;  %p2882_p12 = scmp.lt.s32.totalorder %s2873_s23, %s2873_s23 }
   0x8   : > { %p2746_p6 = pnand %p2749_p4, %p2745_p5  ;;  %p2883_p13 = por %p2882_p12, %p2881_p11 }
   0xa   : > { %p2864_p7 = pneg %p2746_p6 }
   0xc   : > { %p2876_p9 = pnand %p2874_p8, %p2864_p7 }
   0xe   : > { %p2877_p10 = pneg %p2876_p9 }
  0x10   : > { %p2884_p2 = pnand %p2883_p13, %p2877_p10 }
  0x12   : > { %2887 = shalt.err (!%p2884_p2)
}
  0x13   : > { %s2901_s24 = smov 128   ;;  %s2902_s25 = smov 8  }
  0x14   : > { %2748 = dma.hbm_to_vmem [thread:$0]  (!%p2746_p6), %s3792_s3, 256, %s177_s21, [#allocation5], %s2901_s24, %s2901_s24, %s2902_s25  }
  0x15   : > { %201 = sbr.rel (%p2949_p3) target bundleno = 2756 (0xac4), region = 36 }
  0x1a   : > { %2893 = dma.done.wait (%p2749_p4), [#allocation5], 256  }
  0x1b   : > { %2895 = vsyncadd (%p2749_p4), [#allocation5], 4294967040  ;;  %s1877_s28 = sshll.u32 %s2944_s19, 3  ;;  %p3796_p1 = scmp.ne.s32.totalorder %s2944_s19, 0 }
  0x1c   : > { %p231_p0 = scmp.lt.s32.totalorder %s1877_s28, 15 }
  0x1d   : > { %246 = sbr.rel (%p3796_p1) target bundleno = 36 (0x24), region = 44 }
  0x1e   : > { %s3798_s28 = smov (!%p231_p0, %s1877_s28), 15 }
  0x1f   : > { %s1878_s29 = sshll.u32 %s3798_s28, 3  ;;  %s1984_s30 = sshll.u32 %s3798_s28, 4 }
  0x20   : > { %s2971_s8 = scalar_lea.vmem %s3789_s0, %s1878_s29  ;;  %s2976_s11 = scalar_lea.vmem %s3793_s4, %s1984_s30 }
  0x22   : > { %v247_v0 = vld [vmem:[%s3790_s1] sm:$0xff]  ;;  %v249_v1 = vld [vmem:[%s3790_s1 + $0x8] sm:$0xff] }
  0x23   : > { %248 = vst [vmem:[#allocation2] sm:$0xff] %v247_v0  ;;  %250 = vst [vmem:[#allocation3] sm:$0xff] %v249_v1 }
  0x24 PF: > { %v274_v2 = vld [vmem:[%s3791_s2 + $0x78] sm:$0xff]  ;;  %v273_v3 = vld [vmem:[%s3791_s2 + $0x70] sm:$0xff]  ;;  %v272_v4 = vld [vmem:[%s3791_s2 + $0x68] sm:$0xff]  ;;  %vm2907_vm0 = vmmov 0  }
  0x25   : > { %2241 = vmatprep.subr.mxu1 %v274_v2  ;;  %v271_v5 = vld [vmem:[%s3791_s2 + $0x60] sm:$0xff]  ;;  %v270_v7 = vld [vmem:[%s3791_s2 + $0x58] sm:$0xff]  ;;  %v269_v8 = vld [vmem:[%s3791_s2 + $0x50] sm:$0xff] }
  0x26   : > { %2242 = vmatpush3.msra.mxu1 %v274_v2  ;;  %v2999_v6 = vld [vmem:[%s2971_s8] sm:$0xff]  ;;  %v268_v9 = vld [vmem:[%s3791_s2 + $0x48] sm:$0xff]  ;;  %v266_v11 = vld [vmem:[%s3791_s2 + $0x38] sm:$0xff] }
  0x27   : > { %2243 = vmatprep.subr.mxu1 %v273_v3  ;;  %2273 = vmatprep.mubr.f32.mxu1 %v2999_v6  ;;  %v267_v10 = vld [vmem:[%s3791_s2 + $0x40] sm:$0xff]  ;;  %v265_v12 = vld [vmem:[%s3791_s2 + $0x30] sm:$0xff]  ;;  %v264_v13 = vld [vmem:[%s3791_s2 + $0x28] sm:$0xff] }
  0x28   : > { %2244 = vmatpush3.msra.mxu1 %v273_v3  ;;  %v263_v14 = vld [vmem:[%s3791_s2 + $0x20] sm:$0xff]  ;;  %v262_v15 = vld [vmem:[%s3791_s2 + $0x18] sm:$0xff]  ;;  %v261_v16 = vld [vmem:[%s3791_s2 + $0x10] sm:$0xff] }
  0x29   : > { %2245 = vmatprep.subr.mxu1 %v272_v4  ;;  %v260_v17 = vld [vmem:[%s3791_s2 + $0x8] sm:$0xff]  ;;  %v259_v18 = vld [vmem:[%s3791_s2] sm:$0xff]  ;;  %v1899_v20 = vld [vmem:[%s3791_s2 + $0xf8] sm:$0xff] }
  0x2a   : > { %2246 = vmatpush3.msra.mxu1 %v272_v4  ;;  %v3039_v19 = vld [vmem:[%s2971_s8 + $0x8] sm:$0xff]  ;;  %v3045_v21 = vld [vmem:[%s2971_s8 + $0x10] sm:$0xff]  ;;  %v3053_v23 = vld [vmem:[%s2971_s8 + $0x18] sm:$0xff] }
  0x2b   : > { %2247 = vmatprep.subr.mxu1 %v271_v5  ;;  %v1898_v22 = vld [vmem:[%s3791_s2 + $0xf0] sm:$0xff]  ;;  %v1897_v24 = vld [vmem:[%s3791_s2 + $0xe8] sm:$0xff]  ;;  %v255_v25 = vld [vmem:[%s2971_s8 + $0x20] sm:$0xff] }
  0x2c   : > { %2248 = vmatpush3.msra.mxu1 %v271_v5  ;;  %v1896_v26 = vld [vmem:[%s3791_s2 + $0xe0] sm:$0xff]  ;;  %v256_v27 = vld [vmem:[%s2971_s8 + $0x28] sm:$0xff]  ;;  %v1895_v28 = vld [vmem:[%s3791_s2 + $0xd8] sm:$0xff] }
  0x2d   : > { %2249 = vmatprep.subr.mxu1 %v270_v7  ;;  %v257_v29 = vld [vmem:[%s2971_s8 + $0x30] sm:$0xff]  ;;  %v258_v31 = vld [vmem:[%s2971_s8 + $0x38] sm:$0xff]  ;;  %v1893_v32 = vld [vmem:[%s3791_s2 + $0xc8] sm:$0xff] }
  0x2e   : > { %2250 = vmatpush3.msra.mxu1 %v270_v7  ;;  %v1894_v30 = vld [vmem:[%s3791_s2 + $0xd0] sm:$0xff]  ;;  %v1892_v33 = vld [vmem:[%s3791_s2 + $0xc0] sm:$0xff]  ;;  %v1891_v34 = vld [vmem:[%s3791_s2 + $0xb8] sm:$0xff] }
  0x2f   : > { %2251 = vmatprep.subr.mxu1 %v269_v8  ;;  %v1890_v35 = vld [vmem:[%s3791_s2 + $0xb0] sm:$0xff]  ;;  %v1889_v36 = vld [vmem:[%s3791_s2 + $0xa8] sm:$0xff]  ;;  %v1888_v37 = vld [vmem:[%s3791_s2 + $0xa0] sm:$0xff] }
  0x30   : > { %2252 = vmatpush3.msra.mxu1 %v269_v8  ;;  %v1887_v38 = vld [vmem:[%s3791_s2 + $0x98] sm:$0xff]  ;;  %v1886_v39 = vld [vmem:[%s3791_s2 + $0x90] sm:$0xff]  ;;  %v1885_v40 = vld [vmem:[%s3791_s2 + $0x88] sm:$0xff] }
  0x31   : > { %2253 = vmatprep.subr.mxu1 %v268_v9  ;;  %v1884_v41 = vld [vmem:[%s3791_s2 + $0x80] sm:$0xff]  ;;  %v1916_v42 = vld [vmem:[%s3791_s2 + $0x178] sm:$0xff]  ;;  %v1915_v43 = vld [vmem:[%s3791_s2 + $0x170] sm:$0xff] }
  0x32   : > { %2254 = vmatpush3.msra.mxu1 %v268_v9  ;;  %2329 = vmatprep.subr.mxu0 %v1916_v42  ;;  %v1914_v44 = vld [vmem:[%s3791_s2 + $0x168] sm:$0xff]  ;;  %v1913_v45 = vld [vmem:[%s3791_s2 + $0x160] sm:$0xff]  ;;  %v1912_v46 = vld [vmem:[%s3791_s2 + $0x158] sm:$0xff] }
  0x33   : > { %2255 = vmatprep.subr.mxu1 %v267_v10  ;;  %2330 = vmatpush3.msra.mxu0 %v1916_v42  ;;  %v1911_v47 = vld [vmem:[%s3791_s2 + $0x150] sm:$0xff]  ;;  %v1910_v48 = vld [vmem:[%s3791_s2 + $0x148] sm:$0xff]  ;;  %v1909_v49 = vld [vmem:[%s3791_s2 + $0x140] sm:$0xff] }
  0x34   : > { %2256 = vmatpush3.msra.mxu1 %v267_v10  ;;  %2331 = vmatprep.subr.mxu0 %v1915_v43  ;;  %v1908_v50 = vld [vmem:[%s3791_s2 + $0x138] sm:$0xff]  ;;  %v1907_v51 = vld [vmem:[%s3791_s2 + $0x130] sm:$0xff]  ;;  %v1906_v52 = vld [vmem:[%s3791_s2 + $0x128] sm:$0xff] }
  0x35   : > { %2257 = vmatprep.subr.mxu1 %v266_v11  ;;  %2332 = vmatpush3.msra.mxu0 %v1915_v43  ;;  %v1905_v53 = vld [vmem:[%s3791_s2 + $0x120] sm:$0xff]  ;;  %v1883_v54 = vld [vmem:[#allocation4] ss:$0 sm:$0xff] }
  0x36   : > { %2258 = vmatpush3.msra.mxu1 %v266_v11  ;;  %2333 = vmatprep.subr.mxu0 %v1914_v44 }
  0x37   : > { %2259 = vmatprep.subr.mxu1 %v265_v12  ;;  %2334 = vmatpush3.msra.mxu0 %v1914_v44 }
  0x38   : > { %2260 = vmatpush3.msra.mxu1 %v265_v12  ;;  %2335 = vmatprep.subr.mxu0 %v1913_v45 }
  0x39   : > { %2261 = vmatprep.subr.mxu1 %v264_v13  ;;  %2336 = vmatpush3.msra.mxu0 %v1913_v45 }
  0x3a   : > { %2262 = vmatpush3.msra.mxu1 %v264_v13  ;;  %2337 = vmatprep.subr.mxu0 %v1912_v46 }
  0x3b   : > { %2263 = vmatprep.subr.mxu1 %v263_v14  ;;  %2338 = vmatpush3.msra.mxu0 %v1912_v46 }
  0x3c   : > { %2264 = vmatpush3.msra.mxu1 %v263_v14  ;;  %2339 = vmatprep.subr.mxu0 %v1911_v47 }
  0x3d   : > { %2265 = vmatprep.subr.mxu1 %v262_v15  ;;  %2340 = vmatpush3.msra.mxu0 %v1911_v47 }
  0x3e   : > { %2266 = vmatpush3.msra.mxu1 %v262_v15  ;;  %2341 = vmatprep.subr.mxu0 %v1910_v48 }
  0x3f   : > { %2267 = vmatprep.subr.mxu1 %v261_v16  ;;  %2342 = vmatpush3.msra.mxu0 %v1910_v48  ;;  %v2903_v48 = vmov 1  }
  0x40   : > { %2268 = vmatpush3.msra.mxu1 %v261_v16  ;;  %2343 = vmatprep.subr.mxu0 %v1909_v49  ;;  %v1904_v16 = vld [vmem:[%s3791_s2 + $0x118] sm:$0xff] }
  0x41   : > { %2269 = vmatprep.subr.mxu1 %v260_v17  ;;  %2344 = vmatpush3.msra.mxu0 %v1909_v49  ;;  %v2904_v49 = vmov 0  }
  0x42   : > { %2270 = vmatpush3.msra.mxu1 %v260_v17  ;;  %2345 = vmatprep.subr.mxu0 %v1908_v50  ;;  %v1903_v17 = vld [vmem:[%s3791_s2 + $0x110] sm:$0xff] }
  0x43   : > { %2271 = vmatprep.subr.mxu1 %v259_v18  ;;  %2346 = vmatpush3.msra.mxu0 %v1908_v50  ;;  %v1945_v50 = vld [vmem:[%s3791_s2 + $0x1f8] sm:$0xff] }
  0x44   : > { %2272 = vmatpush3.msra.mxu1 %v259_v18  ;;  %2347 = vmatprep.subr.mxu0 %v1907_v51  ;;  %v1902_v18 = vld [vmem:[%s3791_s2 + $0x108] sm:$0xff] }
  0x45   : > { %2274 = vmatmul.mubr.f32.vlgmr.msra.gmra.mxu1 %v3039_v19  ;;  %2285 = vmatprep.subr.mxu1 %v1899_v20 }
  0x46   : > { %2276 = vmatprep.mubr.f32.mxu1 %v3045_v21  ;;  %2286 = vmatpush3.msra.mxu1 %v1899_v20  ;;  %v1901_v20 = vld [vmem:[%s3791_s2 + $0x100] sm:$0xff] }
  0x47   : > { %2287 = vmatprep.subr.mxu1 %v1898_v22  ;;  %2348 = vmatpush3.msra.mxu0 %v1907_v51  ;;  %v1944_v51 = vld [vmem:[%s3791_s2 + $0x1f0] sm:$0xff] }
  0x48   : > { %2288 = vmatpush3.msra.mxu1 %v1898_v22  ;;  %2349 = vmatprep.subr.mxu0 %v1906_v52  ;;  %v1900_v22 = vld [vmem:[#allocation4 + $0x1] ss:$0 sm:$0xff] }
  0x49   : > { %2277 = vmatmul.mubr.f32.gmra.mxu1 %v3053_v23  ;;  %2289 = vmatprep.subr.mxu1 %v1897_v24 }
  0x4a   : > { %2279 = vmatprep.mubr.f32.mxu1 %v255_v25  ;;  %2290 = vmatpush3.msra.mxu1 %v1897_v24 }
  0x4b   : > { %2291 = vmatprep.subr.mxu1 %v1896_v26  ;;  %2350 = vmatpush3.msra.mxu0 %v1906_v52  ;;  %v3161_v52 = vld [vmem:[%s3791_s2 + $0x278] sm:$0xff] }
  0x4c   : > { %2292 = vmatpush3.msra.mxu1 %v1896_v26  ;;  %2351 = vmatprep.subr.mxu0 %v1905_v53 }
  0x4d   : > { %2280 = vmatmul.mubr.f32.gmra.mxu1 %v256_v27  ;;  %2293 = vmatprep.subr.mxu1 %v1895_v28 }
  0x4e   : > { %2282 = vmatprep.mubr.f32.mxu1 %v257_v29  ;;  %2294 = vmatpush3.msra.mxu1 %v1895_v28 }
  0x4f   : > { %2295 = vmatprep.subr.mxu1 %v1894_v30  ;;  %2352 = vmatpush3.msra.mxu0 %v1905_v53  ;;  %v2905_v53 = vmov 0.0  }
  0x50   : > { %2296 = vmatpush3.msra.mxu1 %v1894_v30  ;;  %2353 = vmatprep.subr.mxu0 %v1904_v16 }
  0x51   : > { %2283 = vmatmul.mubr.f32.gmra.mxu1 %v258_v31  ;;  %2297 = vmatprep.subr.mxu1 %v1893_v32 }
  0x52   : > { %2298 = vmatpush3.msra.mxu1 %v1893_v32  ;;  %2354 = vmatpush3.msra.mxu0 %v1904_v16 }
  0x53   : > { %2299 = vmatprep.subr.mxu1 %v1892_v33  ;;  %2355 = vmatprep.subr.mxu0 %v1903_v17 }
  0x54   : > { %2300 = vmatpush3.msra.mxu1 %v1892_v33  ;;  %2356 = vmatpush3.msra.mxu0 %v1903_v17 }
  0x55   : > { %2301 = vmatprep.subr.mxu1 %v1891_v34  ;;  %2357 = vmatprep.subr.mxu0 %v1902_v18 }
  0x56   : > { %2302 = vmatpush3.msra.mxu1 %v1891_v34  ;;  %2358 = vmatpush3.msra.mxu0 %v1902_v18 }
  0x57   : > { %2303 = vmatprep.subr.mxu1 %v1890_v35  ;;  %2359 = vmatprep.subr.mxu0 %v1901_v20 }
  0x58   : > { %2304 = vmatpush3.msra.mxu1 %v1890_v35  ;;  %2360 = vmatpush3.msra.mxu0 %v1901_v20 }
  0x59   : > { %2305 = vmatprep.subr.mxu1 %v1889_v36  ;;  %2768 = vset.pattern.permute.xlu1 %v2903_v48 }
  0x5a   : > { %2306 = vmatpush3.msra.mxu1 %v1889_v36  ;;  %2767 = vset.pattern.permute.xlu0 %v2904_v49 }
  0x5b   : > { %2307 = vmatprep.subr.mxu1 %v1888_v37  ;;  %2417 = vmatprep.subr.mxu0 %v2905_v53 }
  0x5c   : > { %2308 = vmatpush3.msra.mxu1 %v1888_v37 }
  0x5d   : > { %2309 = vmatprep.subr.mxu1 %v1887_v38 }
  0x5e   : > { %2310 = vmatpush3.msra.mxu1 %v1887_v38 }
  0x5f   : > { %2311 = vmatprep.subr.mxu1 %v1886_v39 }
  0x60   : > { %2312 = vmatpush3.msra.mxu1 %v1886_v39 }
  0x61   : > { %2313 = vmatprep.subr.mxu1 %v1885_v40 }
  0x62   : > { %2314 = vmatpush3.msra.mxu1 %v1885_v40 }
  0x63   : > { %2315 = vmatprep.subr.mxu1 %v1884_v41 }
  0x64   : > { %2316 = vmatpush3.msra.mxu1 %v1884_v41 }
  0x65   : > { %2373 = vmatprep.subr.mxu1 %v1945_v50 }
 0x105   : > { %v2275_v55 = vpop.f32.mrf.mxu1 }
 0x106   : > { %v352_v56 = vadd.f32 %v2275_v55, %v1883_v54  ;;  %v1943_v55 = vld [vmem:[%s3791_s2 + $0x1e8] sm:$0xff] }
 0x107   : > { %v346_v57 = vpop.f32.mrf.mxu1 }
 0x108   : > { %v347_v58 = vadd.f32 %v1883_v54, %v346_v57  ;;  %v386_v62 = vmax.f32 %v352_v56, 0.0  ;;  %v3177_v56 = vld [vmem:[%s3791_s2 + $0x268] sm:$0xff]  ;;  %v1942_v57 = vld [vmem:[%s3791_s2 + $0x1e0] sm:$0xff] }
 0x109   : > { %v2278_v59 = vpop.f32.mrf.mxu1 }
 0x10a   : > { %v385_v60 = vmax.f32 %v347_v58, 0.0  ;;  %v362_v61 = vadd.f32 %v2278_v59, %v1883_v54  ;;  %v3187_v58 = vld [vmem:[%s3791_s2 + $0x260] sm:$0xff]  ;;  %v1941_v59 = vld [vmem:[%s3791_s2 + $0x1d8] sm:$0xff] }
 0x10b   : > { %v356_v63 = vpop.f32.mrf.mxu1 }
 0x10c   : > { %2317 = vmatprep.mubr.f32.mxu1 %v385_v60  ;;  %v357_v0 = vadd.f32 %v1883_v54, %v356_v63  ;;  %v388_v1 = vmax.f32 %v362_v61, 0.0  ;;  %v3197_v60 = vld [vmem:[%s3791_s2 + $0x258] sm:$0xff]  ;;  %v1940_v61 = vld [vmem:[%s3791_s2 + $0x1d0] sm:$0xff]  ;;  %v1939_v63 = vld [vmem:[%s3791_s2 + $0x1c8] sm:$0xff] }
 0x10d   : > { %2318 = vmatmul.mubr.f32.vlgmr.msra.gmra.mxu1 %v386_v62  ;;  %v2281_v2 = vpop.f32.mrf.mxu1  ;;  %v3207_v62 = vld [vmem:[%s3791_s2 + $0x250] sm:$0xff] }
 0x10e   : > { %v387_v3 = vmax.f32 %v357_v0, 0.0  ;;  %v372_v4 = vadd.f32 %v2281_v2, %v1883_v54  ;;  %2374 = vmatpush3.msra.mxu1 %v1945_v50  ;;  %v3217_v0 = vld [vmem:[%s3791_s2 + $0x248] sm:$0xff]  ;;  %v3226_v2 = vld [vmem:[#allocation4 + $0x2] ss:$0 sm:$0xff] }
 0x10f   : > { %v366_v5 = vpop.f32.mrf.mxu1  ;;  %2375 = vmatprep.subr.mxu1 %v1944_v51 }
 0x110   : > { %2320 = vmatprep.mubr.f32.mxu1 %v387_v3  ;;  %v367_v7 = vadd.f32 %v1883_v54, %v366_v5  ;;  %v390_v8 = vmax.f32 %v372_v4, 0.0  ;;  %2376 = vmatpush3.msra.mxu1 %v1944_v51  ;;  %v3301_v51 = vld [vmem:[%s3791_s2 + $0x218] sm:$0xff] }
 0x111   : > { %2321 = vmatmul.mubr.f32.gmra.mxu1 %v388_v1  ;;  %v2284_v9 = vpop.f32.mrf.mxu1  ;;  %2377 = vmatprep.subr.mxu1 %v1943_v55  ;;  %v1938_v1 = vld [vmem:[%s3791_s2 + $0x1c0] sm:$0xff] }
 0x112   : > { %v389_v10 = vmax.f32 %v367_v7, 0.0  ;;  %v382_v11 = vadd.f32 %v2284_v9, %v1883_v54  ;;  %2378 = vmatpush3.msra.mxu1 %v1943_v55  ;;  %v1931_v55 = vld [vmem:[%s3791_s2 + $0x188] sm:$0xff] }
 0x113   : > { %v376_v12 = vpop.f32.mrf.mxu1  ;;  %2379 = vmatprep.subr.mxu1 %v1942_v57 }
 0x114   : > { %2323 = vmatprep.mubr.f32.mxu1 %v389_v10  ;;  %v377_v13 = vadd.f32 %v1883_v54, %v376_v12  ;;  %v392_v14 = vmax.f32 %v382_v11, 0.0  ;;  %v3167_v54 = vld [vmem:[%s3791_s2 + $0x270] sm:$0xff]  ;;  %2380 = vmatpush3.msra.mxu1 %v1942_v57 }
 0x115   : > { %2324 = vmatmul.mubr.f32.gmra.mxu1 %v390_v8  ;;  %2381 = vmatprep.subr.mxu1 %v1941_v59 }
 0x116   : > { %v391_v15 = vmax.f32 %v377_v13, 0.0  ;;  %2382 = vmatpush3.msra.mxu1 %v1941_v59 }
 0x117   : > { %2383 = vmatprep.subr.mxu1 %v1940_v61 }
 0x118   : > { %2326 = vmatprep.mubr.f32.mxu1 %v391_v15  ;;  %2384 = vmatpush3.msra.mxu1 %v1940_v61  ;;  %v3312_v61 = vld [vmem:[%s3791_s2 + $0x210] sm:$0xff] }
 0x119   : > { %2327 = vmatmul.mubr.f32.gmra.mxu1 %v392_v14  ;;  %2385 = vmatprep.subr.mxu1 %v1939_v63 }
 0x11a   : > { %2386 = vmatpush3.msra.mxu1 %v1939_v63 }
 0x11b   : > { %2387 = vmatprep.subr.mxu1 %v1938_v1 }
 0x11c   : > { %2388 = vmatpush3.msra.mxu1 %v1938_v1  ;;  %v1930_v1 = vld [vmem:[%s3791_s2 + $0x180] sm:$0xff] }
 0x1cd   : > { %v2319_v24 = vpop.f32.mrf.mxu1 }
 0x1ce   : > { %v487_v25 = vadd.f32 %v2319_v24, %v1900_v22 }
 0x1cf   : > { %v481_v26 = vpop.f32.mrf.mxu1 }
 0x1d0   : > { %v482_v27 = vadd.f32 %v1900_v22, %v481_v26  ;;  %v521_v31 = vmax.f32 %v487_v25, 0.0 }
 0x1d1   : > { %v2322_v28 = vpop.f32.mrf.mxu1 }
 0x1d2   : > { %v520_v29 = vmax.f32 %v482_v27, 0.0  ;;  %v497_v30 = vadd.f32 %v2322_v28, %v1900_v22  ;;  %v1937_v27 = vld [vmem:[%s3791_s2 + $0x1b8] sm:$0xff]  ;;  %v3238_v28 = vld [vmem:[%s3791_s2 + $0x240] sm:$0xff] }
 0x1d3   : > { %v491_v32 = vpop.f32.mrf.mxu1  ;;  %2389 = vmatprep.subr.mxu1 %v1937_v27 }
 0x1d4   : > { %2361 = vmatprep.mubr.f32.mxu0 %v520_v29  ;;  %v492_v33 = vadd.f32 %v1900_v22, %v491_v32  ;;  %v523_v34 = vmax.f32 %v497_v30, 0.0  ;;  %2390 = vmatpush3.msra.mxu1 %v1937_v27  ;;  %v1936_v29 = vld [vmem:[%s3791_s2 + $0x1b0] sm:$0xff] }
 0x1d5   : > { %2362 = vmatmul.mubr.f32.vlgmr.msra.gmra.mxu0 %v521_v31  ;;  %v2325_v35 = vpop.f32.mrf.mxu1  ;;  %2391 = vmatprep.subr.mxu1 %v1936_v29  ;;  %v3248_v31 = vld [vmem:[%s3791_s2 + $0x238] sm:$0xff]  ;;  %v3401_v27 = vld [vmem:[#allocation4 + $0x7] ss:$0 sm:$0xff] }
 0x1d6   : > { %v522_v36 = vmax.f32 %v492_v33, 0.0  ;;  %v507_v37 = vadd.f32 %v2325_v35, %v1900_v22  ;;  %2418 = vmatpush3.msra.mxu0 %v3161_v52  ;;  %2392 = vmatpush3.msra.mxu1 %v1936_v29  ;;  %v3259_v35 = vld [vmem:[%s3791_s2 + $0x230] sm:$0xff] }
 0x1d7   : > { %v501_v38 = vpop.f32.mrf.mxu1  ;;  %2419 = vmatprep.subr.mxu0 %v2905_v53 }
 0x1d8   : > { %2364 = vmatprep.mubr.f32.mxu0 %v522_v36  ;;  %v502_v39 = vadd.f32 %v1900_v22, %v501_v38  ;;  %v525_v40 = vmax.f32 %v507_v37, 0.0  ;;  %2420 = vmatpush3.msra.mxu0 %v3167_v54  ;;  %v1934_v38 = vld [vmem:[%s3791_s2 + $0x1a0] sm:$0xff] }
 0x1d9   : > { %2365 = vmatmul.mubr.f32.gmra.mxu0 %v523_v34  ;;  %v2328_v41 = vpop.f32.mrf.mxu1  ;;  %2421 = vmatprep.subr.mxu0 %v2905_v53  ;;  %v1935_v34 = vld [vmem:[%s3791_s2 + $0x1a8] sm:$0xff] }
 0x1da   : > { %v524_v42 = vmax.f32 %v502_v39, 0.0  ;;  %v517_v43 = vadd.f32 %v2328_v41, %v1900_v22  ;;  %2422 = vmatpush3.msra.mxu0 %v3177_v56  ;;  %2393 = vmatprep.subr.mxu1 %v1935_v34  ;;  %v3270_v39 = vld [vmem:[%s3791_s2 + $0x228] sm:$0xff]  ;;  %v1933_v41 = vld [vmem:[%s3791_s2 + $0x198] sm:$0xff] }
 0x1db   : > { %v511_v44 = vpop.f32.mrf.mxu1  ;;  %2423 = vmatprep.subr.mxu0 %v2905_v53  ;;  %2394 = vmatpush3.msra.mxu1 %v1935_v34 }
 0x1dc   : > { %2367 = vmatprep.mubr.f32.mxu0 %v524_v42  ;;  %v512_v45 = vadd.f32 %v1900_v22, %v511_v44  ;;  %v527_v46 = vmax.f32 %v517_v43, 0.0  ;;  %2424 = vmatpush3.msra.mxu0 %v3187_v58  ;;  %v3283_v42 = vld [vmem:[%s3791_s2 + $0x220] sm:$0xff] }
 0x1dd   : > { %2368 = vmatmul.mubr.f32.gmra.mxu0 %v525_v40  ;;  %2425 = vmatprep.subr.mxu0 %v2905_v53 }
 0x1de   : > { %v526_v47 = vmax.f32 %v512_v45, 0.0  ;;  %2426 = vmatpush3.msra.mxu0 %v3197_v60  ;;  %2395 = vmatprep.subr.mxu1 %v1934_v38 }
 0x1df   : > { %2427 = vmatprep.subr.mxu0 %v2905_v53  ;;  %2396 = vmatpush3.msra.mxu1 %v1934_v38 }
 0x1e0   : > { %2370 = vmatprep.mubr.f32.mxu0 %v526_v47  ;;  %2428 = vmatpush3.msra.mxu0 %v3207_v62  ;;  %v2906_v47 = vmov 2  }
 0x1e1   : > { %2371 = vmatmul.mubr.f32.gmra.mxu0 %v527_v46  ;;  %2429 = vmatprep.subr.mxu0 %v2905_v53  ;;  %v1932_v46 = vld [vmem:[%s3791_s2 + $0x190] sm:$0xff] }
 0x1e2   : > { %2430 = vmatpush3.msra.mxu0 %v3217_v0  ;;  %2397 = vmatprep.subr.mxu1 %v1933_v41 }
 0x1e3   : > { %2431 = vmatprep.subr.mxu0 %v2905_v53  ;;  %2398 = vmatpush3.msra.mxu1 %v1933_v41 }
 0x1e4   : > { %2432 = vmatpush3.msra.mxu0 %v3238_v28  ;;  %2399 = vmatprep.subr.mxu1 %v1932_v46 }
 0x1e5   : > { %2433 = vmatprep.subr.mxu0 %v2905_v53  ;;  %2400 = vmatpush3.msra.mxu1 %v1932_v46 }
 0x1e6   : > { %2434 = vmatpush3.msra.mxu0 %v3248_v31  ;;  %2401 = vmatprep.subr.mxu1 %v1931_v55 }
 0x1e7   : > { %2435 = vmatprep.subr.mxu0 %v2905_v53  ;;  %2402 = vmatpush3.msra.mxu1 %v1931_v55 }
 0x1e8   : > { %2436 = vmatpush3.msra.mxu0 %v3259_v35  ;;  %2403 = vmatprep.subr.mxu1 %v1930_v1 }
 0x1e9   : > { %2437 = vmatprep.subr.mxu0 %v2905_v53  ;;  %2404 = vmatpush3.msra.mxu1 %v1930_v1 }
 0x1ea   : > { %2438 = vmatpush3.msra.mxu0 %v3270_v39  ;;  %2449 = vmatprep.mubr.msk.f32.mxu0 %vm2907_vm0, %v2905_v53 }
 0x1eb   : > { %2439 = vmatprep.subr.mxu0 %v2905_v53  ;;  %2452 = vmatprep.subr.mxu1 %v2905_v53 }
 0x1ec   : > { %2440 = vmatpush3.msra.mxu0 %v3283_v42 }
 0x1ed   : > { %2441 = vmatprep.subr.mxu0 %v2905_v53 }
 0x1ee   : > { %2442 = vmatpush3.msra.mxu0 %v3301_v51 }
 0x1ef   : > { %2443 = vmatprep.subr.mxu0 %v2905_v53 }
 0x1f0   : > { %2444 = vmatpush3.msra.mxu0 %v3312_v61 }
 0x1f1   : > { %2445 = vmatprep.subr.mxu0 %v2905_v53 }
 0x295   : > { %v2363_v3 = vpop.f32.mrf.mxu0 }
 0x296   : > { %v622_v4 = vadd.f32 %v2363_v3, %v3226_v2 }
 0x297   : > { %v616_v5 = vpop.f32.mrf.mxu0 }
 0x298   : > { %v1919_v7 = vmul.f32 -1.442695, %v622_v4  ;;  %v617_v8 = vadd.f32 %v3226_v2, %v616_v5  ;;  %v3322_v4 = vld [vmem:[%s3791_s2 + $0x208] sm:$0xff] }
 0x299   : > { %v2366_v9 = vpop.f32.mrf.mxu0  ;;  %2446 = vmatpush3.msra.mxu0 %v3322_v4 }
 0x29a   : > { %2787 = vpow2.f32 %v1919_v7  ;;  %v1918_v10 = vmul.f32 -1.442695, %v617_v8  ;;  %v632_v11 = vadd.f32 %v2366_v9, %v3226_v2  ;;  %v3331_v7 = vld [vmem:[%s3791_s2 + $0x200] sm:$0xff]  ;;  %2447 = vmatprep.subr.mxu0 %v2905_v53 }
 0x29b   : > { %v626_v12 = vpop.f32.mrf.mxu0  ;;  %2448 = vmatpush3.msra.mxu0 %v3331_v7 }
 0x29c   : > { %2789 = vpow2.f32 %v1918_v10  ;;  %v1921_v13 = vmul.f32 -1.442695, %v632_v11  ;;  %v627_v14 = vadd.f32 %v3226_v2, %v626_v12  ;;  %v1021_v10 = vld [vmem:[#allocation3] sm:$0xff]  ;;  %2487 = vmatprep.subr.mxu0 %v2905_v53 }
 0x29d   : > { %v2369_v30 = vpop.f32.mrf.mxu0  ;;  %2450 = vmatmul.mubr.f32.vlgmr.msra.gmra.mxu0 %v1021_v10 }
 0x29e   : > { %2791 = vpow2.f32 %v1921_v13  ;;  %v1920_v15 = vmul.f32 -1.442695, %v627_v14  ;;  %v642_v33 = vadd.f32 %v2369_v30, %v3226_v2  ;;  %2488 = vmatpush3.msra.mxu0 %v3161_v52  ;;  %2519 = vmatprep.mubr.msk.f32.mxu0 %vm2907_vm0, %v2905_v53 }
 0x29f   : > { %v636_v44 = vpop.f32.mrf.mxu0  ;;  %2489 = vmatprep.subr.mxu0 %v2905_v53 }
 0x2a0   : > { %2793 = vpow2.f32 %v1920_v15  ;;  %v1923_v37 = vmul.f32 -1.442695, %v642_v33  ;;  %v637_v45 = vadd.f32 %v3226_v2, %v636_v44  ;;  %2490 = vmatpush3.msra.mxu0 %v3167_v54 }
 0x2a1   : > { %v2372_v57 = vpop.f32.mrf.mxu0  ;;  %2491 = vmatprep.subr.mxu0 %v2905_v53 }
 0x2a2   : > { %v1922_v50 = vmul.f32 -1.442695, %v637_v45  ;;  %v652_v59 = vadd.f32 %v2372_v57, %v3226_v2  ;;  %2492 = vmatpush3.msra.mxu0 %v3177_v56 }
 0x2a3   : > { %v646_v3 = vpop.f32.mrf.mxu0  ;;  %2493 = vmatprep.subr.mxu0 %v2905_v53 }
 0x2a4   : > { %v1925_v63 = vmul.f32 -1.442695, %v652_v59  ;;  %v647_v5 = vadd.f32 %v3226_v2, %v646_v3  ;;  %2494 = vmatpush3.msra.mxu0 %v3187_v58 }
 0x2a5   : > { %2495 = vmatprep.subr.mxu0 %v2905_v53 }
 0x2a6   : > { %v1924_v8 = vmul.f32 -1.442695, %v647_v5  ;;  %2496 = vmatpush3.msra.mxu0 %v3197_v60 }
 0x2a7   : > { %v2788_v16 = vpop.eup %2787  ;;  %2497 = vmatprep.subr.mxu0 %v2905_v53 }
 0x2a8   : > { %v680_v17 = vadd.f32 1.0, %v2788_v16  ;;  %2498 = vmatpush3.msra.mxu0 %v3207_v62 }
 0x2a9   : > { %v2790_v18 = vpop.eup %2789  ;;  %2499 = vmatprep.subr.mxu0 %v2905_v53 }
 0x2aa   : > { %2795 = vrcp.f32 %v680_v17  ;;  %v679_v20 = vadd.f32 1.0, %v2790_v18  ;;  %2500 = vmatpush3.msra.mxu0 %v3217_v0 }
 0x2ab   : > { %v2792_v22 = vpop.eup %2791  ;;  %2501 = vmatprep.subr.mxu0 %v2905_v53 }
 0x2ac   : > { %2797 = vrcp.f32 %v679_v20  ;;  %v682_v24 = vadd.f32 1.0, %v2792_v22  ;;  %2502 = vmatpush3.msra.mxu0 %v3238_v28 }
 0x2ad   : > { %v2794_v25 = vpop.eup %2793  ;;  %2503 = vmatprep.subr.mxu0 %v2905_v53 }
 0x2ae   : > { %2799 = vrcp.f32 %v682_v24  ;;  %v681_v26 = vadd.f32 1.0, %v2794_v25  ;;  %2504 = vmatpush3.msra.mxu0 %v3248_v31  ;;  %v3398_v24 = vld [vmem:[#allocation4 + $0x8] ss:$0 sm:$0xff] }
 0x2af   : > { %2505 = vmatprep.subr.mxu0 %v2905_v53 }
 0x2b0   : > { %2801 = vrcp.f32 %v681_v26  ;;  %2506 = vmatpush3.msra.mxu0 %v3259_v35 }
 0x2b1   : > { %2803 = vpow2.f32 %v1923_v37  ;;  %2507 = vmatprep.subr.mxu0 %v2905_v53  ;;  %v3409_v37 = vld [vmem:[#allocation4 + $0xa] ss:$0 sm:$0xff] }
 0x2b2   : > { %2805 = vpow2.f32 %v1922_v50  ;;  %2508 = vmatpush3.msra.mxu0 %v3270_v39 }
 0x2b3   : > { %2807 = vpow2.f32 %v1925_v63  ;;  %2509 = vmatprep.subr.mxu0 %v2905_v53 }
 0x2b4   : > { %2809 = vpow2.f32 %v1924_v8  ;;  %2510 = vmatpush3.msra.mxu0 %v3283_v42 }
 0x2b5   : > { %2511 = vmatprep.subr.mxu0 %v2905_v53 }
 0x2b6   : > { %2512 = vmatpush3.msra.mxu0 %v3301_v51 }
 0x2b7   : > { %v2796_v32 = vpop.eup %2795  ;;  %2513 = vmatprep.subr.mxu0 %v2905_v53 }
 0x2b8   : > { %704 = vst [vmem:[%s2976_s11 + $0x18] sm:$0xff] %v2796_v32  ;;  %783 = vperm.xlu1 %2768, %v2796_v32   ;;  %720 = vperm.xlu0 %2767, %v2796_v32  }
 0x2b9   : > { %v2798_v36 = vpop.eup %2797  ;;  %2514 = vmatpush3.msra.mxu0 %v3312_v61 }
 0x2ba   : > { %703 = vst [vmem:[%s2976_s11 + $0x8] sm:$0xff] %v2798_v36  ;;  %2515 = vmatprep.subr.mxu0 %v2905_v53 }
 0x2bb   : > { %v3272_v40 = vpop.eup %2799  ;;  %2516 = vmatpush3.msra.mxu0 %v3322_v4 }
 0x2bc   : > { %779 = vperm.xlu1 %2768, %v2798_v36   ;;  %715 = vperm.xlu0 %2767, %v2798_v36   ;;  %706 = vst [vmem:[%s2976_s11 + $0x38] sm:$0xff] %v3272_v40 }
 0x2bd   : > { %v3285_v43 = vpop.eup %2801  ;;  %2517 = vmatprep.subr.mxu0 %v2905_v53 }
 0x2be   : > { %705 = vst [vmem:[%s2976_s11 + $0x28] sm:$0xff] %v3285_v43  ;;  %v2804_v9 = vpop.eup %2803  ;;  %2518 = vmatpush3.msra.mxu0 %v3331_v7 }
 0x2bf   : > { %v684_v2 = vadd.f32 1.0, %v2804_v9  ;;  %v2806_v11 = vpop.eup %2805  ;;  %2557 = vmatprep.subr.mxu0 %v2905_v53 }
 0x2c0   : > { %2770 = vset.pattern.permute.xlu1 %v2906_v47  ;;  %2769 = vset.pattern.permute.xlu0 %v2906_v47  ;;  %v683_v12 = vadd.f32 1.0, %v2806_v11  ;;  %v2808_v13 = vpop.eup %2807 }
 0x2c1   : > { %836 = vperm.xlu1 %2770, %v2796_v32   ;;  %832 = vperm.xlu0 %2769, %v2798_v36   ;;  %2811 = vrcp.f32 %v684_v2  ;;  %v686_v14 = vadd.f32 1.0, %v2808_v13  ;;  %v2810_v15 = vpop.eup %2809  ;;  %v3403_v32 = vld [vmem:[#allocation4 + $0x9] ss:$0 sm:$0xff] }
 0x2c2   : > { %2813 = vrcp.f32 %v683_v12  ;;  %v685_v16 = vadd.f32 1.0, %v2810_v15 }
 0x2c3   : > { %2815 = vrcp.f32 %v686_v14 }
 0x2c4   : > { %2817 = vrcp.f32 %v685_v16 }
 0x2c5   : > { %2772 = vset.pattern.permute.xlu1 %v2903_v48  ;;  %2771 = vset.pattern.permute.xlu0 %v2904_v49 }
 0x2c6   : > { %791 = vperm.xlu1 %2772, %v3272_v40   ;;  %730 = vperm.xlu0 %2771, %v3272_v40  }
 0x2ca   : > { %2773 = vset.pattern.permute.xlu1 %v2906_v47 }
 0x2cb   : > { %844 = vperm.xlu1 %2773, %v3272_v40  }
 0x2ce   : > { %v2812_v17 = vpop.eup %2811 }
 0x2cf   : > { %2774 = vset.pattern.permute.xlu1 %v2904_v49  ;;  %708 = vst [vmem:[%s2976_s11 + $0x58] sm:$0xff] %v2812_v17  ;;  %740 = vperm.xlu0 %2771, %v2812_v17   ;;  %v2814_v18 = vpop.eup %2813 }
 0x2d0   : > { %725 = vperm.xlu1 %2774, %v3285_v43   ;;  %707 = vst [vmem:[%s2976_s11 + $0x48] sm:$0xff] %v2814_v18  ;;  %v2816_v20 = vpop.eup %2815 }
 0x2d1   : > { %710 = vst [vmem:[%s2976_s11 + $0x78] sm:$0xff] %v2816_v20  ;;  %v2818_v22 = vpop.eup %2817 }
 0x2d2   : > { %709 = vst [vmem:[%s2976_s11 + $0x68] sm:$0xff] %v2818_v22 }
 0x2d3   : > { %735 = vperm.xlu0 %2771, %v2814_v18  }
 0x2d4   : > { %2775 = vset.pattern.permute.xlu1 %v2903_v48 }
 0x2d5   : > { %787 = vperm.xlu1 %2775, %v3285_v43  }
 0x2d7   : > { %2779 = vset.pattern.permute.xlu0 %v2903_v48 }
 0x2d8   : > { %795 = vperm.xlu0 %2779, %v2814_v18  }
 0x2d9   : > { %2776 = vset.pattern.permute.xlu1 %v2906_v47 }
 0x2da   : > { %840 = vperm.xlu1 %2776, %v3285_v43  }
 0x2dc   : > { %2780 = vset.pattern.permute.xlu0 %v2906_v47 }
 0x2dd   : > { %848 = vperm.xlu0 %2780, %v2814_v18  }
 0x2de   : > { %2777 = vset.pattern.permute.xlu1 %v2903_v48 }
 0x2df   : > { %799 = vperm.xlu1 %2777, %v2812_v17  }
 0x2e1   : > { %2784 = vset.pattern.permute.xlu0 %v2903_v48 }
 0x2e2   : > { %803 = vperm.xlu0 %2784, %v2818_v22  }
 0x2e3   : > { %2778 = vset.pattern.permute.xlu1 %v2906_v47 }
 0x2e4   : > { %852 = vperm.xlu1 %2778, %v2812_v17  }
 0x2e6   : > { %2786 = vset.pattern.permute.xlu0 %v2906_v47 }
 0x2e7   : > { %860 = vperm.xlu0 %2786, %v2816_v20  }
 0x2e8   : > { %2781 = vset.pattern.permute.xlu1 %v2904_v49 }
 0x2e9   : > { %750 = vperm.xlu1 %2781, %v2816_v20  }
 0x2ed   : > { %2782 = vset.pattern.permute.xlu1 %v2903_v48 }
 0x2ee   : > { %807 = vperm.xlu1 %2782, %v2816_v20  }
 0x2f2   : > { %2783 = vset.pattern.permute.xlu1 %v2904_v49 }
 0x2f3   : > { %745 = vperm.xlu1 %2783, %v2818_v22  }
 0x2f7   : > { %2785 = vset.pattern.permute.xlu1 %v2906_v47 }
 0x2f8   : > { %856 = vperm.xlu1 %2785, %v2818_v22  }
 0x333   : > { %v784_v25 = vpop.permute.xlu1 %783  ;;  %v721_v48 = vpop.permute.xlu0 %720 }
 0x334   : > { %v758_v26 = vmul.f32 %v3398_v24, %v721_v48  ;;  %v815_v38 = vmul.f32 %v3403_v32, %v784_v25 }
 0x336   : > { %v770_v33 = vadd.f32 %v3401_v27, %v758_v26 }
 0x337   : > { %v780_v29 = vpop.permute.xlu1 %779  ;;  %v716_v30 = vpop.permute.xlu0 %715 }
 0x338   : > { %v757_v49 = vmul.f32 %v3398_v24, %v716_v30  ;;  %v814_v34 = vmul.f32 %v3403_v32, %v780_v29  ;;  %v823_v44 = vadd.f32 %v815_v38, %v770_v33 }
 0x33a   : > { %v769_v36 = vadd.f32 %v3401_v27, %v757_v49 }
 0x33c   : > { %v837_v40 = vpop.permute.xlu1 %836  ;;  %v822_v41 = vadd.f32 %v814_v34, %v769_v36  ;;  %v833_v43 = vpop.permute.xlu0 %832 }
 0x33d   : > { %v868_v45 = vmul.f32 %v3409_v37, %v837_v40  ;;  %v867_v46 = vmul.f32 %v3409_v37, %v833_v43 }
 0x33f   : > { %v876_v47 = vadd.f32 %v868_v45, %v823_v44  ;;  %v875_v50 = vadd.f32 %v867_v46, %v822_v41 }
 0x341   : > { %v884_v55 = vmul.f32 %v876_v47, %v3039_v19  ;;  %v883_v57 = vmul.f32 %v875_v50, %v2999_v6  ;;  %v792_v59 = vpop.permute.xlu1 %791  ;;  %v731_v1 = vpop.permute.xlu0 %730 }
 0x342   : > { %v760_v3 = vmul.f32 %v3398_v24, %v731_v1  ;;  %v817_v5 = vmul.f32 %v3403_v32, %v792_v59 }
 0x343   : > { %2405 = vmatprep.mubr.f32.mxu1 %v883_v57 }
 0x344   : > { %2406 = vmatmul.mubr.f32.vlgmr.msra.gmra.mxu1 %v884_v55  ;;  %v772_v8 = vadd.f32 %v3401_v27, %v760_v3  ;;  %v2851_v55 = vld [vmem:[%s2971_s8 + $0x28] sm:$0xff] }
 0x345   : > { %2453 = vmatpush3.msra.mxu1 %v3161_v52 }
 0x346   : > { %v845_v63 = vpop.permute.xlu1 %844  ;;  %2454 = vmatprep.subr.mxu1 %v2905_v53  ;;  %v825_v12 = vadd.f32 %v817_v5, %v772_v8 }
 0x347   : > { %2455 = vmatpush3.msra.mxu1 %v3167_v54  ;;  %v870_v2 = vmul.f32 %v3409_v37, %v845_v63  ;;  %v2852_v63 = vld [vmem:[%s2971_s8 + $0x20] sm:$0xff] }
 0x348   : > { %2456 = vmatprep.subr.mxu1 %v2905_v53 }
 0x349   : > { %2457 = vmatpush3.msra.mxu1 %v3177_v56  ;;  %v878_v16 = vadd.f32 %v870_v2, %v825_v12 }
 0x34a   : > { %2458 = vmatprep.subr.mxu1 %v2905_v53  ;;  %v741_v15 = vpop.permute.xlu0 %740 }
 0x34b   : > { %v726_v6 = vpop.permute.xlu1 %725  ;;  %2459 = vmatpush3.msra.mxu1 %v3187_v58  ;;  %v762_v20 = vmul.f32 %v3398_v24, %v741_v15  ;;  %v886_v22 = vmul.f32 %v878_v16, %v3053_v23 }
 0x34c   : > { %v759_v19 = vmul.f32 %v3398_v24, %v726_v6  ;;  %2460 = vmatprep.subr.mxu1 %v2905_v53 }
 0x34d   : > { %2461 = vmatpush3.msra.mxu1 %v3197_v60  ;;  %v774_v49 = vadd.f32 %v3401_v27, %v762_v20  ;;  %v2854_v20 = vld [vmem:[%s2971_s8 + $0x30] sm:$0xff] }
 0x34e   : > { %2462 = vmatprep.subr.mxu1 %v2905_v53  ;;  %v771_v9 = vadd.f32 %v3401_v27, %v759_v19  ;;  %v736_v26 = vpop.permute.xlu0 %735 }
 0x34f   : > { %2463 = vmatpush3.msra.mxu1 %v3207_v62  ;;  %v761_v29 = vmul.f32 %v3398_v24, %v736_v26 }
 0x350   : > { %v788_v10 = vpop.permute.xlu1 %787  ;;  %2464 = vmatprep.subr.mxu1 %v2905_v53 }
 0x351   : > { %v816_v11 = vmul.f32 %v3403_v32, %v788_v10  ;;  %2465 = vmatpush3.msra.mxu1 %v3217_v0 }
 0x352   : > { %2466 = vmatprep.subr.mxu1 %v2905_v53 }
 0x353   : > { %2467 = vmatpush3.msra.mxu1 %v3238_v28  ;;  %v824_v13 = vadd.f32 %v816_v11, %v771_v9  ;;  %v796_v33 = vpop.permute.xlu0 %795 }
 0x354   : > { %2468 = vmatprep.subr.mxu1 %v2905_v53  ;;  %v818_v38 = vmul.f32 %v3403_v32, %v796_v33 }
 0x355   : > { %v841_v14 = vpop.permute.xlu1 %840  ;;  %2469 = vmatpush3.msra.mxu1 %v3248_v31 }
 0x356   : > { %v869_v17 = vmul.f32 %v3409_v37, %v841_v14  ;;  %2470 = vmatprep.subr.mxu1 %v2905_v53 }
 0x357   : > { %2471 = vmatpush3.msra.mxu1 %v3259_v35 }
 0x358   : > { %v877_v18 = vadd.f32 %v869_v17, %v824_v13  ;;  %2472 = vmatprep.subr.mxu1 %v2905_v53  ;;  %v849_v44 = vpop.permute.xlu0 %848  ;;  %v2853_v17 = vld [vmem:[%s2971_s8 + $0x38] sm:$0xff] }
 0x359   : > { %2473 = vmatpush3.msra.mxu1 %v3270_v39  ;;  %v871_v45 = vmul.f32 %v3409_v37, %v849_v44 }
 0x35a   : > { %v800_v25 = vpop.permute.xlu1 %799  ;;  %v885_v48 = vmul.f32 %v877_v18, %v3045_v21  ;;  %2474 = vmatprep.subr.mxu1 %v2905_v53  ;;  %v773_v21 = vadd.f32 %v3401_v27, %v761_v29  ;;  %v3483_v29 = vld [vmem:[#allocation4 + $0x5] ss:$0 sm:$0xff] }
 0x35b   : > { %2475 = vmatpush3.msra.mxu1 %v3283_v42  ;;  %v819_v30 = vmul.f32 %v3403_v32, %v800_v25  ;;  %v3480_v25 = vld [vmem:[#allocation4 + $0x3] ss:$0 sm:$0xff] }
 0x35c   : > { %2408 = vmatprep.mubr.f32.mxu1 %v885_v48  ;;  %2476 = vmatprep.subr.mxu1 %v2905_v53  ;;  %v826_v41 = vadd.f32 %v818_v38, %v773_v21 }
 0x35d   : > { %2409 = vmatmul.mubr.f32.gmra.mxu1 %v886_v22  ;;  %v827_v34 = vadd.f32 %v819_v30, %v774_v49  ;;  %v804_v59 = vpop.permute.xlu0 %803  ;;  %v3486_v49 = vld [vmem:[#allocation4 + $0x6] ss:$0 sm:$0xff] }
 0x35e   : > { %2477 = vmatpush3.msra.mxu1 %v3301_v51  ;;  %v879_v47 = vadd.f32 %v871_v45, %v826_v41  ;;  %v820_v9 = vmul.f32 %v3403_v32, %v804_v59 }
 0x35f   : > { %v853_v23 = vpop.permute.xlu1 %852  ;;  %2478 = vmatprep.subr.mxu1 %v2905_v53 }
 0x360   : > { %2479 = vmatpush3.msra.mxu1 %v3312_v61  ;;  %v872_v36 = vmul.f32 %v3409_v37, %v853_v23  ;;  %v887_v1 = vmul.f32 %v2852_v63, %v879_v47 }
 0x361   : > { %2480 = vmatprep.subr.mxu1 %v2905_v53 }
 0x362   : > { %2481 = vmatpush3.msra.mxu1 %v3322_v4  ;;  %v880_v43 = vadd.f32 %v872_v36, %v827_v34  ;;  %2411 = vmatprep.mubr.f32.mxu1 %v887_v1  ;;  %v861_v10 = vpop.permute.xlu0 %860 }
 0x363   : > { %2482 = vmatprep.subr.mxu1 %v2905_v53  ;;  %v874_v2 = vmul.f32 %v3409_v37, %v861_v10 }
 0x364   : > { %v751_v40 = vpop.permute.xlu1 %750  ;;  %2483 = vmatpush3.msra.mxu1 %v3331_v7  ;;  %v888_v57 = vmul.f32 %v2851_v55, %v880_v43 }
 0x365   : > { %2522 = vmatprep.subr.mxu1 %v2905_v53  ;;  %v764_v46 = vmul.f32 %v3398_v24, %v751_v40 }
 0x366   : > { %2412 = vmatmul.mubr.f32.gmra.mxu1 %v888_v57 }
 0x367   : > { %v776_v3 = vadd.f32 %v3401_v27, %v764_v46 }
 0x369   : > { %v808_v50 = vpop.permute.xlu1 %807 }
 0x36a   : > { %v821_v6 = vmul.f32 %v3403_v32, %v808_v50 }
 0x36c   : > { %v829_v5 = vadd.f32 %v821_v6, %v776_v3 }
 0x36e   : > { %v746_v19 = vpop.permute.xlu1 %745  ;;  %v882_v14 = vadd.f32 %v874_v2, %v829_v5 }
 0x36f   : > { %v763_v8 = vmul.f32 %v3398_v24, %v746_v19  ;;  %v1105_v24 = vpop.f32.mrf.mxu0 }
 0x370   : > { %v890_v18 = vmul.f32 %v2853_v17, %v882_v14  ;;  %v2857_v17 = vld [vmem:[%s3791_s2 + $0x268] sm:$0xff] }
 0x371   : > { %v775_v11 = vadd.f32 %v3401_v27, %v763_v8  ;;  %v2451_v32 = vpop.f32.mrf.mxu0 }
 0x373   : > { %v828_v12 = vadd.f32 %v820_v9, %v775_v11  ;;  %v857_v13 = vpop.permute.xlu1 %856 }
 0x374   : > { %v873_v15 = vmul.f32 %v3409_v37, %v857_v13  ;;  %v1020_v37 = vld [vmem:[#allocation2] sm:$0xff] }
 0x375   : > { %v1113_v23 = vmul.f32 %v3483_v29, %v1020_v37 }
 0x376   : > { %v881_v16 = vadd.f32 %v873_v15, %v828_v12  ;;  %v2855_v15 = vld [vmem:[%s3791_s2 + $0x278] sm:$0xff] }
 0x378   : > { %v889_v22 = vmul.f32 %v2854_v20, %v881_v16  ;;  %v2856_v16 = vld [vmem:[%s3791_s2 + $0x270] sm:$0xff]  ;;  %v2859_v20 = vld [vmem:[%s3791_s2 + $0x258] sm:$0xff] }
 0x37a   : > { %2414 = vmatprep.mubr.f32.mxu1 %v889_v22  ;;  %v2860_v22 = vld [vmem:[%s3791_s2 + $0x250] sm:$0xff] }
 0x37b   : > { %2415 = vmatmul.mubr.f32.gmra.mxu1 %v890_v18  ;;  %v2858_v18 = vld [vmem:[%s3791_s2 + $0x260] sm:$0xff] }
 0x37c   : > { %2484 = vmatprep.mubr.msk.f32.mxu1 %vm2907_vm0, %v2905_v53 }
 0x404   : > { %v2407_v27 = vpop.f32.mrf.mxu1 }
 0x405   : > { %v985_v48 = vadd.f32 %v2407_v27, %v3480_v25 }
 0x406   : > { %v979_v26 = vpop.f32.mrf.mxu1 }
 0x407   : > { %v980_v30 = vadd.f32 %v3480_v25, %v979_v26 }
 0x409   : > { %v1114_v21 = vadd.f32 %v1105_v24, %v980_v30  ;;  %v2861_v30 = vld [vmem:[%s3791_s2 + $0x248] sm:$0xff] }
 0x40b   : > { %v1119_v33 = vmul.f32 %v3486_v49, %v1114_v21  ;;  %v1976_v21 = vld [vmem:[%s3791_s2 + $0x2d8] sm:$0xff] }
 0x40d   : > { %v1120_v34 = vadd.f32 %v1119_v33, %v1113_v23  ;;  %v1977_v23 = vld [vmem:[%s3791_s2 + $0x2e0] sm:$0xff]  ;;  %v1975_v33 = vld [vmem:[%s3791_s2 + $0x2d0] sm:$0xff] }
 0x40f   : > { %2819 = vtanh.f32 %v1120_v34  ;;  %v1192_v3 = vmul.f32 %v3483_v29, %v1120_v34  ;;  %v1974_v34 = vld [vmem:[%s3791_s2 + $0x2c8] sm:$0xff] }
 0x41c   : > { %v3490_v36 = vpop.eup %2819 }
 0x41d   : > { %2485 = vmatmul.mubr.f32.vlgmr.msra.gmra.mxu1 %v3490_v36  ;;  %v2410_v38 = vpop.f32.mrf.mxu1 }
 0x41e   : > { %v3494_v40 = vadd.f32 %v2410_v38, %v3480_v25  ;;  %2523 = vmatpush3.msra.mxu1 %v3161_v52  ;;  %2554 = vmatprep.mubr.msk.f32.mxu1 %vm2907_vm0, %v2905_v53  ;;  %v1972_v38 = vld [vmem:[%s3791_s2 + $0x2b8] sm:$0xff] }
 0x41f   : > { %v989_v41 = vpop.f32.mrf.mxu1  ;;  %2524 = vmatprep.subr.mxu1 %v2905_v53 }
 0x420   : > { %v3501_v43 = vadd.f32 %v3480_v25, %v989_v41  ;;  %2525 = vmatpush3.msra.mxu1 %v3167_v54  ;;  %v1970_v41 = vld [vmem:[%s3791_s2 + $0x2a8] sm:$0xff] }
 0x421   : > { %2526 = vmatprep.subr.mxu1 %v2905_v53 }
 0x422   : > { %2527 = vmatpush3.msra.mxu1 %v3177_v56 }
 0x423   : > { %2528 = vmatprep.subr.mxu1 %v2905_v53 }
 0x424   : > { %2529 = vmatpush3.msra.mxu1 %v3187_v58 }
 0x425   : > { %2530 = vmatprep.subr.mxu1 %v2905_v53 }
 0x426   : > { %2531 = vmatpush3.msra.mxu1 %v3197_v60  ;;  %v2413_v44 = vpop.f32.mrf.mxu1 }
 0x427   : > { %2532 = vmatprep.subr.mxu1 %v2905_v53  ;;  %v3518_v45 = vadd.f32 %v2413_v44, %v3480_v25  ;;  %v1968_v44 = vld [vmem:[%s3791_s2 + $0x298] sm:$0xff] }
 0x428   : > { %2533 = vmatpush3.msra.mxu1 %v3207_v62  ;;  %v999_v46 = vpop.f32.mrf.mxu1 }
 0x429   : > { %2534 = vmatprep.subr.mxu1 %v2905_v53  ;;  %v3523_v47 = vadd.f32 %v3480_v25, %v999_v46  ;;  %v1966_v46 = vld [vmem:[%s3791_s2 + $0x288] sm:$0xff] }
 0x42a   : > { %2535 = vmatpush3.msra.mxu1 %v3217_v0 }
 0x42b   : > { %2536 = vmatprep.subr.mxu1 %v2905_v53 }
 0x42c   : > { %2537 = vmatpush3.msra.mxu1 %v3238_v28 }
 0x42d   : > { %2538 = vmatprep.subr.mxu1 %v2905_v53 }
 0x42e   : > { %2539 = vmatpush3.msra.mxu1 %v3248_v31 }
 0x42f   : > { %2540 = vmatprep.subr.mxu1 %v2905_v53 }
 0x430   : > { %2541 = vmatpush3.msra.mxu1 %v3259_v35 }
 0x431   : > { %2542 = vmatprep.subr.mxu1 %v2905_v53 }
 0x432   : > { %2543 = vmatpush3.msra.mxu1 %v3270_v39 }
 0x433   : > { %2544 = vmatprep.subr.mxu1 %v2905_v53 }
 0x434   : > { %2545 = vmatpush3.msra.mxu1 %v3283_v42 }
 0x435   : > { %2546 = vmatprep.subr.mxu1 %v2905_v53 }
 0x436   : > { %2547 = vmatpush3.msra.mxu1 %v3301_v51 }
 0x437   : > { %2548 = vmatprep.subr.mxu1 %v2905_v53 }
 0x438   : > { %2549 = vmatpush3.msra.mxu1 %v3312_v61 }
 0x439   : > { %2550 = vmatprep.subr.mxu1 %v2905_v53 }
 0x43a   : > { %2551 = vmatpush3.msra.mxu1 %v3322_v4 }
 0x43b   : > { %v2416_v50 = vpop.f32.mrf.mxu1  ;;  %2552 = vmatprep.subr.mxu1 %v2905_v53 }
 0x43c   : > { %v3538_v55 = vadd.f32 %v2416_v50, %v3480_v25  ;;  %2553 = vmatpush3.msra.mxu1 %v3331_v7 }
 0x43d   : > { %2592 = vmatprep.subr.mxu1 %v2905_v53  ;;  %v3542_v57 = vpop.f32.mrf.mxu1 }
 0x43e   : > { %v1010_v50 = vadd.f32 %v3480_v25, %v3542_v57 }
 0x4dd   : > { %v1188_v59 = vpop.f32.mrf.mxu1 }
 0x4de   : > { %v1193_v63 = vadd.f32 %v1188_v59, %v985_v48 }
 0x4df   : > { %v2486_v1 = vpop.f32.mrf.mxu1 }
 0x4e0   : > { %v1194_v6 = vmul.f32 %v3486_v49, %v1193_v63 }
 0x4e2   : > { %v1195_v19 = vadd.f32 %v1194_v6, %v1192_v3 }
 0x4e4   : > { %2821 = vtanh.f32 %v1195_v19  ;;  %v1267_v2 = vmul.f32 %v3483_v29, %v1195_v19 }
 0x4f1   : > { %v3546_v5 = vpop.eup %2821 }
 0x4f2   : > { %2520 = vmatmul.mubr.f32.vlgmr.msra.gmra.mxu0 %v3546_v5 }
 0x4f3   : > { %2558 = vmatpush3.msra.mxu0 %v3161_v52  ;;  %2589 = vmatprep.mubr.msk.f32.mxu0 %vm2907_vm0, %v2905_v53 }
 0x4f4   : > { %2559 = vmatprep.subr.mxu0 %v2905_v53 }
 0x4f5   : > { %2560 = vmatpush3.msra.mxu0 %v3167_v54 }
 0x4f6   : > { %2561 = vmatprep.subr.mxu0 %v2905_v53 }
 0x4f7   : > { %2562 = vmatpush3.msra.mxu0 %v3177_v56 }
 0x4f8   : > { %2563 = vmatprep.subr.mxu0 %v2905_v53 }
 0x4f9   : > { %2564 = vmatpush3.msra.mxu0 %v3187_v58 }
 0x4fa   : > { %2565 = vmatprep.subr.mxu0 %v2905_v53 }
 0x4fb   : > { %2566 = vmatpush3.msra.mxu0 %v3197_v60 }
 0x4fc   : > { %2567 = vmatprep.subr.mxu0 %v2905_v53 }
 0x4fd   : > { %2568 = vmatpush3.msra.mxu0 %v3207_v62 }
 0x4fe   : > { %2569 = vmatprep.subr.mxu0 %v2905_v53 }
 0x4ff   : > { %2570 = vmatpush3.msra.mxu0 %v3217_v0 }
 0x500   : > { %2571 = vmatprep.subr.mxu0 %v2905_v53 }
 0x501   : > { %2572 = vmatpush3.msra.mxu0 %v3238_v28 }
 0x502   : > { %2573 = vmatprep.subr.mxu0 %v2905_v53 }
 0x503   : > { %2574 = vmatpush3.msra.mxu0 %v3248_v31 }
 0x504   : > { %2575 = vmatprep.subr.mxu0 %v2905_v53 }
 0x505   : > { %2576 = vmatpush3.msra.mxu0 %v3259_v35 }
 0x506   : > { %2577 = vmatprep.subr.mxu0 %v2905_v53 }
 0x507   : > { %2578 = vmatpush3.msra.mxu0 %v3270_v39 }
 0x508   : > { %2579 = vmatprep.subr.mxu0 %v2905_v53 }
 0x509   : > { %2580 = vmatpush3.msra.mxu0 %v3283_v42 }
 0x50a   : > { %2581 = vmatprep.subr.mxu0 %v2905_v53 }
 0x50b   : > { %2582 = vmatpush3.msra.mxu0 %v3301_v51 }
 0x50c   : > { %2583 = vmatprep.subr.mxu0 %v2905_v53 }
 0x50d   : > { %2584 = vmatpush3.msra.mxu0 %v3312_v61 }
 0x50e   : > { %2585 = vmatprep.subr.mxu0 %v2905_v53 }
 0x50f   : > { %2586 = vmatpush3.msra.mxu0 %v3322_v4 }
 0x510   : > { %2587 = vmatprep.subr.mxu0 %v2905_v53 }
 0x511   : > { %2588 = vmatpush3.msra.mxu0 %v3331_v7 }
 0x512   : > { %2627 = vmatprep.subr.mxu0 %v2905_v53 }
 0x5b2   : > { %v1263_v8 = vpop.f32.mrf.mxu0 }
 0x5b3   : > { %v1268_v9 = vadd.f32 %v1263_v8, %v3501_v43  ;;  %v1969_v43 = vld [vmem:[%s3791_s2 + $0x2a0] sm:$0xff]  ;;  %v1981_v8 = vld [vmem:[#allocation4 + $0x4] ss:$0 sm:$0xff] }
 0x5b4   : > { %v2521_v10 = vpop.f32.mrf.mxu0 }
 0x5b5   : > { %v1269_v11 = vmul.f32 %v3486_v49, %v1268_v9 }
 0x5b7   : > { %v1270_v12 = vadd.f32 %v1269_v11, %v1267_v2 }
 0x5b9   : > { %2823 = vtanh.f32 %v1270_v12 }
 0x5c6   : > { %v3586_v13 = vpop.eup %2823 }
 0x5c7   : > { %2555 = vmatmul.mubr.f32.vlgmr.msra.gmra.mxu1 %v3586_v13 }
 0x5c8   : > { %2593 = vmatpush3.msra.mxu1 %v3161_v52  ;;  %2624 = vmatprep.mubr.msk.f32.mxu1 %vm2907_vm0, %v2905_v53 }
 0x5c9   : > { %2594 = vmatprep.subr.mxu1 %v2905_v53 }
 0x5ca   : > { %2595 = vmatpush3.msra.mxu1 %v3167_v54 }
 0x5cb   : > { %2596 = vmatprep.subr.mxu1 %v2905_v53 }
 0x5cc   : > { %2597 = vmatpush3.msra.mxu1 %v3177_v56 }
 0x5cd   : > { %2598 = vmatprep.subr.mxu1 %v2905_v53 }
 0x5ce   : > { %2599 = vmatpush3.msra.mxu1 %v3187_v58  ;;  %v1342_v58 = vmul.f32 %v3483_v29, %v1270_v12 }
 0x5cf   : > { %2600 = vmatprep.subr.mxu1 %v2905_v53 }
 0x5d0   : > { %2601 = vmatpush3.msra.mxu1 %v3197_v60 }
 0x5d1   : > { %2602 = vmatprep.subr.mxu1 %v2905_v53 }
 0x5d2   : > { %2603 = vmatpush3.msra.mxu1 %v3207_v62 }
 0x5d3   : > { %2604 = vmatprep.subr.mxu1 %v2905_v53 }
 0x5d4   : > { %2605 = vmatpush3.msra.mxu1 %v3217_v0 }
 0x5d5   : > { %2606 = vmatprep.subr.mxu1 %v2905_v53 }
 0x5d6   : > { %2607 = vmatpush3.msra.mxu1 %v3238_v28 }
 0x5d7   : > { %2608 = vmatprep.subr.mxu1 %v2905_v53 }
 0x5d8   : > { %2609 = vmatpush3.msra.mxu1 %v3248_v31 }
 0x5d9   : > { %2610 = vmatprep.subr.mxu1 %v2905_v53 }
 0x5da   : > { %2611 = vmatpush3.msra.mxu1 %v3259_v35 }
 0x5db   : > { %2612 = vmatprep.subr.mxu1 %v2905_v53 }
 0x5dc   : > { %2613 = vmatpush3.msra.mxu1 %v3270_v39 }
 0x5dd   : > { %2614 = vmatprep.subr.mxu1 %v2905_v53 }
 0x5de   : > { %2615 = vmatpush3.msra.mxu1 %v3283_v42 }
 0x5df   : > { %2616 = vmatprep.subr.mxu1 %v2905_v53 }
 0x5e0   : > { %2617 = vmatpush3.msra.mxu1 %v3301_v51 }
 0x5e1   : > { %2618 = vmatprep.subr.mxu1 %v2905_v53 }
 0x5e2   : > { %2619 = vmatpush3.msra.mxu1 %v3312_v61 }
 0x5e3   : > { %2620 = vmatprep.subr.mxu1 %v2905_v53 }
 0x5e4   : > { %2621 = vmatpush3.msra.mxu1 %v3322_v4 }
 0x5e5   : > { %2622 = vmatprep.subr.mxu1 %v2905_v53 }
 0x5e6   : > { %2623 = vmatpush3.msra.mxu1 %v3331_v7 }
 0x5e7   : > { %2662 = vmatprep.subr.mxu1 %v2905_v53 }
 0x687   : > { %v1338_v52 = vpop.f32.mrf.mxu1 }
 0x688   : > { %v1343_v54 = vadd.f32 %v1338_v52, %v3494_v40  ;;  %v1971_v40 = vld [vmem:[%s3791_s2 + $0x2b0] sm:$0xff] }
 0x689   : > { %v2556_v56 = vpop.f32.mrf.mxu1 }
 0x68a   : > { %v1344_v60 = vmul.f32 %v3486_v49, %v1343_v54 }
 0x68c   : > { %v1345_v62 = vadd.f32 %v1344_v60, %v1342_v58 }
 0x68e   : > { %2825 = vtanh.f32 %v1345_v62  ;;  %v1417_v27 = vmul.f32 %v3483_v29, %v1345_v62 }
 0x69b   : > { %v3626_v14 = vpop.eup %2825 }
 0x69c   : > { %2590 = vmatmul.mubr.f32.vlgmr.msra.gmra.mxu0 %v3626_v14 }
 0x69d   : > { %2628 = vmatpush3.msra.mxu0 %v2855_v15  ;;  %2659 = vmatprep.mubr.msk.f32.mxu0 %vm2907_vm0, %v2905_v53 }
 0x69e   : > { %2629 = vmatprep.subr.mxu0 %v2905_v53 }
 0x69f   : > { %2630 = vmatpush3.msra.mxu0 %v2856_v16 }
 0x6a0   : > { %2631 = vmatprep.subr.mxu0 %v2905_v53 }
 0x6a1   : > { %2632 = vmatpush3.msra.mxu0 %v2857_v17 }
 0x6a2   : > { %2633 = vmatprep.subr.mxu0 %v2905_v53 }
 0x6a3   : > { %2634 = vmatpush3.msra.mxu0 %v2858_v18 }
 0x6a4   : > { %2635 = vmatprep.subr.mxu0 %v2905_v53 }
 0x6a5   : > { %2636 = vmatpush3.msra.mxu0 %v2859_v20 }
 0x6a6   : > { %2637 = vmatprep.subr.mxu0 %v2905_v53 }
 0x6a7   : > { %2638 = vmatpush3.msra.mxu0 %v2860_v22 }
 0x6a8   : > { %2639 = vmatprep.subr.mxu0 %v2905_v53 }
 0x6a9   : > { %2640 = vmatpush3.msra.mxu0 %v3217_v0 }
 0x6aa   : > { %2641 = vmatprep.subr.mxu0 %v2905_v53 }
 0x6ab   : > { %2642 = vmatpush3.msra.mxu0 %v3238_v28 }
 0x6ac   : > { %2643 = vmatprep.subr.mxu0 %v2905_v53 }
 0x6ad   : > { %2644 = vmatpush3.msra.mxu0 %v3248_v31 }
 0x6ae   : > { %2645 = vmatprep.subr.mxu0 %v2905_v53 }
 0x6af   : > { %2646 = vmatpush3.msra.mxu0 %v3259_v35 }
 0x6b0   : > { %2647 = vmatprep.subr.mxu0 %v2905_v53 }
 0x6b1   : > { %2648 = vmatpush3.msra.mxu0 %v3270_v39 }
 0x6b2   : > { %2649 = vmatprep.subr.mxu0 %v2905_v53 }
 0x6b3   : > { %2650 = vmatpush3.msra.mxu0 %v3283_v42 }
 0x6b4   : > { %2651 = vmatprep.subr.mxu0 %v2905_v53 }
 0x6b5   : > { %2652 = vmatpush3.msra.mxu0 %v3301_v51 }
 0x6b6   : > { %2653 = vmatprep.subr.mxu0 %v2905_v53 }
 0x6b7   : > { %2654 = vmatpush3.msra.mxu0 %v3312_v61 }
 0x6b8   : > { %2655 = vmatprep.subr.mxu0 %v2905_v53 }
 0x6b9   : > { %2656 = vmatpush3.msra.mxu0 %v3322_v4 }
 0x6ba   : > { %2657 = vmatprep.subr.mxu0 %v2905_v53 }
 0x6bb   : > { %2658 = vmatpush3.msra.mxu0 %v3331_v7 }
 0x75c   : > { %v1413_v0 = vpop.f32.mrf.mxu0 }
 0x75d   : > { %v1418_v24 = vadd.f32 %v1413_v0, %v3523_v47  ;;  %v1965_v47 = vld [vmem:[%s3791_s2 + $0x280] sm:$0xff] }
 0x75e   : > { %v2591_v32 = vpop.f32.mrf.mxu0 }
 0x75f   : > { %v1419_v48 = vmul.f32 %v3486_v49, %v1418_v24 }
 0x761   : > { %v1420_v26 = vadd.f32 %v1419_v48, %v1417_v27 }
 0x763   : > { %2827 = vtanh.f32 %v1420_v26 }
 0x770   : > { %v3677_v37 = vpop.eup %2827 }
 0x771   : > { %2625 = vmatmul.mubr.f32.vlgmr.msra.gmra.mxu1 %v3677_v37 }
 0x772   : > { %2663 = vmatpush3.msra.mxu1 %v2855_v15  ;;  %2694 = vmatprep.mubr.msk.f32.mxu1 %vm2907_vm0, %v2905_v53 }
 0x773   : > { %2664 = vmatprep.subr.mxu1 %v2905_v53 }
 0x774   : > { %2665 = vmatpush3.msra.mxu1 %v2856_v16 }
 0x775   : > { %2666 = vmatprep.subr.mxu1 %v2905_v53 }
 0x776   : > { %2667 = vmatpush3.msra.mxu1 %v2857_v17 }
 0x777   : > { %2668 = vmatprep.subr.mxu1 %v2905_v53 }
 0x778   : > { %2669 = vmatpush3.msra.mxu1 %v2858_v18 }
 0x779   : > { %2670 = vmatprep.subr.mxu1 %v2905_v53 }
 0x77a   : > { %2671 = vmatpush3.msra.mxu1 %v2859_v20 }
 0x77b   : > { %2672 = vmatprep.subr.mxu1 %v2905_v53 }
 0x77c   : > { %2673 = vmatpush3.msra.mxu1 %v2860_v22 }
 0x77d   : > { %2674 = vmatprep.subr.mxu1 %v2905_v53 }
 0x77e   : > { %2675 = vmatpush3.msra.mxu1 %v2861_v30 }
 0x77f   : > { %2676 = vmatprep.subr.mxu1 %v2905_v53 }
 0x780   : > { %2677 = vmatpush3.msra.mxu1 %v3238_v28  ;;  %v1980_v28 = vld [vmem:[%s3791_s2 + $0x2f8] sm:$0xff] }
 0x781   : > { %2678 = vmatprep.subr.mxu1 %v2905_v53  ;;  %2697 = vmatprep.subr.mxu0 %v1980_v28 }
 0x782   : > { %2679 = vmatpush3.msra.mxu1 %v3248_v31 }
 0x783   : > { %2680 = vmatprep.subr.mxu1 %v2905_v53 }
 0x784   : > { %2681 = vmatpush3.msra.mxu1 %v3259_v35 }
 0x785   : > { %2682 = vmatprep.subr.mxu1 %v2905_v53 }
 0x786   : > { %2683 = vmatpush3.msra.mxu1 %v3270_v39 }
 0x787   : > { %2684 = vmatprep.subr.mxu1 %v2905_v53 }
 0x788   : > { %2685 = vmatpush3.msra.mxu1 %v3283_v42  ;;  %v1492_v42 = vmul.f32 %v3483_v29, %v1420_v26 }
 0x789   : > { %2686 = vmatprep.subr.mxu1 %v2905_v53 }
 0x78a   : > { %2687 = vmatpush3.msra.mxu1 %v3301_v51 }
 0x78b   : > { %2688 = vmatprep.subr.mxu1 %v2905_v53 }
 0x78c   : > { %2689 = vmatpush3.msra.mxu1 %v3312_v61 }
 0x78d   : > { %2690 = vmatprep.subr.mxu1 %v2905_v53 }
 0x78e   : > { %2691 = vmatpush3.msra.mxu1 %v3322_v4 }
 0x78f   : > { %2692 = vmatprep.subr.mxu1 %v2905_v53  ;;  %v1979_v53 = vld [vmem:[%s3791_s2 + $0x2f0] sm:$0xff] }
 0x790   : > { %2693 = vmatpush3.msra.mxu1 %v3331_v7  ;;  %v1978_v7 = vld [vmem:[%s3791_s2 + $0x2e8] sm:$0xff] }
 0x831   : > { %v1488_v31 = vpop.f32.mrf.mxu1 }
 0x832   : > { %v1493_v35 = vadd.f32 %v1488_v31, %v3518_v45  ;;  %v1967_v45 = vld [vmem:[%s3791_s2 + $0x290] sm:$0xff] }
 0x833   : > { %v2626_v39 = vpop.f32.mrf.mxu1 }
 0x834   : > { %v1494_v51 = vmul.f32 %v3486_v49, %v1493_v35 }
 0x836   : > { %v1495_v61 = vadd.f32 %v1494_v51, %v1492_v42 }
 0x838   : > { %2829 = vtanh.f32 %v1495_v61  ;;  %v1567_v3 = vmul.f32 %v3483_v29, %v1495_v61 }
 0x845   : > { %v2830_v4 = vpop.eup %2829 }
 0x846   : > { %2660 = vmatmul.mubr.f32.vlgmr.msra.gmra.mxu0 %v2830_v4 }
 0x847   : > { %2698 = vmatpush3.msra.mxu0 %v1980_v28  ;;  %2729 = vmatprep.mubr.f32.mxu0 %v3490_v36  ;;  %v1973_v36 = vld [vmem:[%s3791_s2 + $0x2c0] sm:$0xff] }
 0x848   : > { %2699 = vmatprep.subr.mxu0 %v1979_v53 }
 0x849   : > { %2700 = vmatpush3.msra.mxu0 %v1979_v53 }
 0x84a   : > { %2701 = vmatprep.subr.mxu0 %v1978_v7 }
 0x84b   : > { %2702 = vmatpush3.msra.mxu0 %v1978_v7 }
 0x84c   : > { %2703 = vmatprep.subr.mxu0 %v1977_v23 }
 0x84d   : > { %2704 = vmatpush3.msra.mxu0 %v1977_v23 }
 0x84e   : > { %2705 = vmatprep.subr.mxu0 %v1976_v21 }
 0x84f   : > { %2706 = vmatpush3.msra.mxu0 %v1976_v21 }
 0x850   : > { %2707 = vmatprep.subr.mxu0 %v1975_v33 }
 0x851   : > { %2708 = vmatpush3.msra.mxu0 %v1975_v33 }
 0x852   : > { %2709 = vmatprep.subr.mxu0 %v1974_v34 }
 0x853   : > { %2710 = vmatpush3.msra.mxu0 %v1974_v34 }
 0x854   : > { %2711 = vmatprep.subr.mxu0 %v1973_v36 }
 0x855   : > { %2712 = vmatpush3.msra.mxu0 %v1973_v36 }
 0x856   : > { %2713 = vmatprep.subr.mxu0 %v1972_v38 }
 0x857   : > { %2714 = vmatpush3.msra.mxu0 %v1972_v38 }
 0x858   : > { %2715 = vmatprep.subr.mxu0 %v1971_v40 }
 0x859   : > { %2716 = vmatpush3.msra.mxu0 %v1971_v40 }
 0x85a   : > { %2717 = vmatprep.subr.mxu0 %v1970_v41 }
 0x85b   : > { %2718 = vmatpush3.msra.mxu0 %v1970_v41 }
 0x85c   : > { %2719 = vmatprep.subr.mxu0 %v1969_v43 }
 0x85d   : > { %2720 = vmatpush3.msra.mxu0 %v1969_v43 }
 0x85e   : > { %2721 = vmatprep.subr.mxu0 %v1968_v44 }
 0x85f   : > { %2722 = vmatpush3.msra.mxu0 %v1968_v44 }
 0x860   : > { %2723 = vmatprep.subr.mxu0 %v1967_v45 }
 0x861   : > { %2724 = vmatpush3.msra.mxu0 %v1967_v45 }
 0x862   : > { %2725 = vmatprep.subr.mxu0 %v1966_v46 }
 0x863   : > { %2726 = vmatpush3.msra.mxu0 %v1966_v46 }
 0x864   : > { %2727 = vmatprep.subr.mxu0 %v1965_v47 }
 0x865   : > { %2728 = vmatpush3.msra.mxu0 %v1965_v47 }
 0x866   : > { %2730 = vmatmul.mubr.f32.vlgmr.msra.gmra.mxu0 %v3546_v5 }
 0x867   : > { %2732 = vmatprep.mubr.f32.mxu0 %v3586_v13 }
 0x86a   : > { %2733 = vmatmul.mubr.f32.gmra.mxu0 %v3626_v14 }
 0x86b   : > { %2735 = vmatprep.mubr.f32.mxu0 %v3677_v37 }
 0x86e   : > { %2736 = vmatmul.mubr.f32.gmra.mxu0 %v2830_v4 }
 0x906   : > { %v1563_v59 = vpop.f32.mrf.mxu0 }
 0x907   : > { %v1568_v63 = vadd.f32 %v1563_v59, %v1010_v50 }
 0x908   : > { %v2661_v1 = vpop.f32.mrf.mxu0 }
 0x909   : > { %v1569_v6 = vmul.f32 %v3486_v49, %v1568_v63 }
 0x90b   : > { %v1570_v19 = vadd.f32 %v1569_v6, %v1567_v3 }
 0x90d   : > { %2831 = vtanh.f32 %v1570_v19  ;;  %v1642_v0 = vmul.f32 %v3483_v29, %v1570_v19 }
 0x91a   : > { %v2832_v5 = vpop.eup %2831 }
 0x91b   : > { %2695 = vmatmul.mubr.f32.vlgmr.msra.gmra.mxu1 %v2832_v5  ;;  %2738 = vmatprep.mubr.f32.mxu0 %v2832_v5 }
 0x926   : > { %v2731_v9 = vpop.f32.mrf.mxu0 }
 0x927   : > { %v1745_v10 = vadd.f32 %v2731_v9, %v1981_v8 }
 0x928   : > { %v1739_v2 = vpop.f32.mrf.mxu0 }
 0x929   : > { %2833 = vtanh.f32 %v1745_v10  ;;  %v1740_v11 = vadd.f32 %v1981_v8, %v1739_v2 }
 0x92a   : > { %v2734_v25 = vpop.f32.mrf.mxu0 }
 0x92b   : > { %2835 = vtanh.f32 %v1740_v11  ;;  %v1755_v57 = vadd.f32 %v2734_v25, %v1981_v8 }
 0x92c   : > { %v1749_v12 = vpop.f32.mrf.mxu0 }
 0x92d   : > { %2837 = vtanh.f32 %v1755_v57  ;;  %v1750_v13 = vadd.f32 %v1981_v8, %v1749_v12 }
 0x92e   : > { %v2737_v52 = vpop.f32.mrf.mxu0 }
 0x92f   : > { %2839 = vtanh.f32 %v1750_v13  ;;  %v1765_v54 = vadd.f32 %v2737_v52, %v1981_v8 }
 0x930   : > { %v1759_v56 = vpop.f32.mrf.mxu0 }
 0x931   : > { %2841 = vtanh.f32 %v1765_v54  ;;  %v1760_v58 = vadd.f32 %v1981_v8, %v1759_v56 }
 0x933   : > { %2843 = vtanh.f32 %v1760_v58 }
 0x936   : > { %v2834_v60 = vpop.eup %2833 }
 0x937   : > { %1787 = vst [vmem:[%s2976_s11 + $0x10] sm:$0xff] %v2834_v60 }
 0x938   : > { %v2836_v62 = vpop.eup %2835 }
 0x939   : > { %1786 = vst [vmem:[%s2976_s11] sm:$0xff] %v2836_v62 }
 0x93a   : > { %v2838_v14 = vpop.eup %2837 }
 0x93b   : > { %1789 = vst [vmem:[%s2976_s11 + $0x30] sm:$0xff] %v2838_v14 }
 0x93c   : > { %v2840_v15 = vpop.eup %2839 }
 0x93d   : > { %1788 = vst [vmem:[%s2976_s11 + $0x20] sm:$0xff] %v2840_v15 }
 0x93e   : > { %v2842_v16 = vpop.eup %2841 }
 0x93f   : > { %1791 = vst [vmem:[%s2976_s11 + $0x50] sm:$0xff] %v2842_v16 }
 0x940   : > { %v2844_v17 = vpop.eup %2843 }
 0x941   : > { %1790 = vst [vmem:[%s2976_s11 + $0x40] sm:$0xff] %v2844_v17 }
 0x9db   : > { %v1638_v18 = vpop.f32.mrf.mxu1 }
 0x9dc   : > { %v1643_v20 = vadd.f32 %v1638_v18, %v3538_v55 }
 0x9dd   : > { %v2696_v22 = vpop.f32.mrf.mxu1 }
 0x9de   : > { %v1644_v24 = vmul.f32 %v3486_v49, %v1643_v20 }
 0x9e0   : > { %v1645_v32 = vadd.f32 %v1644_v24, %v1642_v0 }
 0x9e2   : > { %2845 = vtanh.f32 %v1645_v32  ;;  %1647 = vst [vmem:[#allocation2] sm:$0xff] %v1645_v32  ;;  %1649 = vst [vmem:[%s3794_s5] sm:$0xff] %v1645_v32 }
 0x9ef   : > { %v2846_v27 = vpop.eup %2845 }
 0x9f0   : > { %1648 = vst [vmem:[#allocation3] sm:$0xff] %v2846_v27  ;;  %1650 = vst [vmem:[%s3794_s5 + $0x8] sm:$0xff] %v2846_v27  ;;  %2739 = vmatmul.mubr.f32.gmra.mxu0 %v2846_v27 }
 0xab0   : > { %v2740_v55 = vpop.f32.mrf.mxu0 }
 0xab1   : > { %v1775_v29 = vadd.f32 %v2740_v55, %v1981_v8 }
 0xab2   : > { %v1769_v48 = vpop.f32.mrf.mxu0 }
 0xab3   : > { %2847 = vtanh.f32 %v1775_v29  ;;  %v1770_v49 = vadd.f32 %v1981_v8, %v1769_v48 }
 0xab5   : > { %2849 = vtanh.f32 %v1770_v49 }
 0xac0   : > { %v2848_v26 = vpop.eup %2847 }
 0xac1   : > { %1793 = vst [vmem:[%s2976_s11 + $0x70] sm:$0xff] %v2848_v26 }
 0xac2   : > { %v2850_v37 = vpop.eup %2849 }
 0xac3   : > { %1792 = vst [vmem:[%s2976_s11 + $0x60] sm:$0xff] %v2850_v37 }
 0xac4 PF: > { %s17_s18 = sadd.s32 1, %s2898_s18  }
 0xac5   : > { %p14_p2 = scmp.ge.s32.totalorder %s17_s18, 4  }
 0xac7   :  { %16 = sbr.rel (!%p14_p2) target bundleno = 1 (0x1), region = 88 }
 0xacc   :  { %1824 = vsyncpa [#allocation5], 1 }
 0xacd   :  { %1826 = vsyncpa [#allocation5 + $0x1], 1 }

</bundles_post_ra>
